<compile_context>
chip_gen: v7x
topology: tpu7x:2x2x1
jax: 0.10.0
libtpu: 0.0.40
codegen_flags: <defaults>
</compile_context>

<pallas_src>
import jax
import jax.numpy as jnp
from jax import lax
from jax.experimental import pallas as pl
from jax.experimental.pallas import tpu as pltpu


def _round_up(x, m):
    return ((x + m - 1) // m) * m


def gru_encoder_kernel(emb_ref, w_ih_ref, w_hh_ref, b_all_ref, b_hn_ref,
                       out_ref, h_ref, gi_ref, hs_ref):
    """One (batch_block, time_chunk) tile of the GRU encoder.

    emb_ref  : [Tc, Bb, Ep]   bf16  embedded inputs (time-major within the chunk)
    w_ih_ref : [Ep, 3*Hp]     bf16  input-to-hidden weights (gate columns r|z|n)
    w_hh_ref : [Hp, 3*Hp]     bf16  hidden-to-hidden weights
    b_all_ref: [1, 3*Hp]      f32   b_ih (all gates) + b_hh (r, z gates only)
    b_hn_ref : [1, Hp]        f32   b_hh for the n gate (stays inside r * (...))
    out_ref  : [Bb, Tc, Hp]   f32   batch-major output block
    h_ref    : [Bb, Hp]       f32   scratch: hidden state carried across chunks
    gi_ref   : [Tc, Bb, 3Hp]  f32   scratch: per-chunk input projection
    hs_ref   : [Tc, Bb, Hp]   f32   scratch: per-chunk hidden states (time-major)
    """
    # New batch block starts at time-chunk 0 -> reset the carried hidden state.
    @pl.when(pl.program_id(1) == 0)
    def _():
        h_ref[...] = jnp.zeros_like(h_ref)

    tc, bb, ep = emb_ref.shape
    hp = h_ref.shape[1]

    # --- Hoisted, chunk-wide input projection: one fat (tc*bb)-row MXU GEMM.
    #     Result lives only in VMEM; gi never round-trips through HBM.
    x2d = emb_ref[...].reshape(tc * bb, ep)                       # bf16
    gi2d = jnp.dot(x2d, w_ih_ref[...],
                   preferred_element_type=jnp.float32)            # [tc*bb, 3Hp] f32
    gi_ref[...] = (gi2d + b_all_ref[...]).reshape(tc, bb, 3 * hp)

    w_hh = w_hh_ref[...]                                          # [Hp, 3Hp] bf16
    b_hn = jnp.broadcast_to(b_hn_ref[...], (bb, hp))              # hoisted broadcast

    # --- Serial GRU recurrence over the chunk (partial unroll for LLO visibility,
    #     bounded code size / vreg live ranges).
    def step(i, h):
        gh = jnp.dot(h.astype(w_hh.dtype), w_hh,
                     preferred_element_type=jnp.float32)          # [Bb, 3Hp]
        g = gi_ref[i]                                             # [Bb, 3Hp]
        r = jax.nn.sigmoid(g[:, :hp] + gh[:, :hp])
        z = jax.nn.sigmoid(g[:, hp:2 * hp] + gh[:, hp:2 * hp])
        n = jnp.tanh(g[:, 2 * hp:] + r * (gh[:, 2 * hp:] + b_hn))
        h = (1.0 - z) * n + z * h
        hs_ref[i] = h                 # lane-dense store, leading-dim dynamic index
        return h

    h_ref[...] = lax.fori_loop(0, tc, step, h_ref[...], unroll=8)

    # --- Re-layout the chunk to batch-major with static copies so the HBM output
    #     is already batch_first (no wrapper transpose pass over [T,B,H]).
    for i in range(tc):
        out_ref[:, i, :] = hs_ref[i]


@jax.jit
def encoder_forward(x_ids, params):
    """x_ids: int32 [B, T] token ids. Returns (out [B, T, H], hidden [1, B, H])."""
    emb_table = params["emb"]            # [V, E]
    w_ih = params["w_ih"]                # [3H, E]  (PyTorch layout, rows r|z|n)
    w_hh = params["w_hh"]                # [3H, H]
    b_ih = params["b_ih"]                # [3H]
    b_hh = params["b_hh"]                # [3H]

    B, T = x_ids.shape
    E = emb_table.shape[1]
    H = w_hh.shape[1]

    Hp = _round_up(H, 128)               # lane-aligned hidden size
    Ep = _round_up(E, 128)               # lane-aligned embedding size
    Bp = _round_up(B, 8)                 # sublane-aligned batch

    # Time chunking: up to 64 steps per grid iteration; pad T up to a multiple of
    # the chunk. Padded steps come after all valid steps, so they never corrupt
    # valid outputs (and are sliced off below).
    t_chunk = min(64, _round_up(T, 8))
    Tp = _round_up(T, t_chunk)
    nt = Tp // t_chunk

    # Split the batch over the "parallel" grid axis only when each block still has
    # >= 128 rows (feeds v7x's two TensorCores without starving the MXU; on
    # single-TC v5e/v6e small batches always keep nb = 1).
    nb = 2 if (Bp % 16 == 0 and Bp // 2 >= 128) else 1
    Bb = Bp // nb

    # --- Parameter prep: transpose + pad so every gate block starts at a
    #     128-aligned column; padded rows/cols are zero (padded h lanes stay 0).
    def prep_w(w, in_dim, in_dim_p):     # [3H, in_dim] -> [in_dim_p, 3*Hp]
        w3 = w.reshape(3, H, in_dim)
        w3 = jnp.pad(w3, ((0, 0), (0, Hp - H), (0, in_dim_p - in_dim)))
        return jnp.transpose(w3, (2, 0, 1)).reshape(in_dim_p, 3 * Hp)

    def prep_b(b):                       # [3H] -> [1, 3*Hp]
        b3 = b.reshape(3, H)
        return jnp.pad(b3, ((0, 0), (0, Hp - H))).reshape(1, 3 * Hp)

    w_ih_p = prep_w(w_ih, E, Ep).astype(jnp.bfloat16)    # [Ep, 3Hp]
    w_hh_p = prep_w(w_hh, H, Hp).astype(jnp.bfloat16)    # [Hp, 3Hp]

    b_ih_p = prep_b(b_ih)                                # [1, 3Hp]
    b_hh_p = prep_b(b_hh)                                # [1, 3Hp]
    gate_mask_rz = jnp.concatenate(
        [jnp.ones((1, 2 * Hp), jnp.float32), jnp.zeros((1, Hp), jnp.float32)], axis=1)
    b_all = b_ih_p + b_hh_p * gate_mask_rz   # b_ih (all gates) + b_hh (r, z only)
    b_hn = b_hh_p[:, 2 * Hp:]                # [1, Hp] stays inside the step

    # --- Pre-pad the (tiny) id array and the embedding table, then gather straight
    #     into the padded, time-major, bf16 layout the kernel consumes.
    emb_table_p = jnp.pad(emb_table, ((0, 0), (0, Ep - E))).astype(jnp.bfloat16)
    x_pad = jnp.pad(x_ids, ((0, Bp - B), (0, Tp - T)))              # [Bp, Tp] ids
    embed_tm = jnp.take(emb_table_p, x_pad.T, axis=0)               # [Tp, Bp, Ep] bf16

    # --- VMEM budget from the actual tile footprint (v7x-safe; capped at 48 MiB).
    vmem_need = (
        2 * t_chunk * Bb * Ep * 2            # embed tile, double-buffered, bf16
        + 2 * Bb * t_chunk * Hp * 4          # out tile, double-buffered, f32
        + 2 * (Ep + Hp) * 3 * Hp * 2         # w_ih + w_hh tiles, bf16
        + 2 * (3 * Hp + Hp) * 4              # bias tiles, f32
        + Bb * Hp * 4                        # carried h scratch
        + t_chunk * Bb * 3 * Hp * 4          # gi scratch
        + t_chunk * Bb * Hp * 4              # hs scratch
    )
    vmem_limit = int(min(max(2 * vmem_need, 16 * 1024 * 1024), 48 * 1024 * 1024))

    cost = pl.CostEstimate(
        flops=2 * Tp * Bp * 3 * Hp * (Ep + Hp) + 12 * Tp * Bp * Hp,
        transcendentals=3 * Tp * Bp * Hp,
        bytes_accessed=(embed_tm.size * 2 + Bp * Tp * Hp * 4
                        + w_ih_p.size * 2 + w_hh_p.size * 2
                        + b_all.size * 4 + b_hn.size * 4),
    )

    out_p = pl.pallas_call(
        gru_encoder_kernel,
        out_shape=jax.ShapeDtypeStruct((Bp, Tp, Hp), jnp.float32),
        grid_spec=pltpu.PrefetchScalarGridSpec(
            num_scalar_prefetch=0,
            grid=(nb, nt),
            in_specs=[
                pl.BlockSpec((t_chunk, Bb, Ep), lambda b, t: (t, b, 0)),   # embeds
                pl.BlockSpec((Ep, 3 * Hp), lambda b, t: (0, 0)),           # w_ih
                pl.BlockSpec((Hp, 3 * Hp), lambda b, t: (0, 0)),           # w_hh
                pl.BlockSpec((1, 3 * Hp), lambda b, t: (0, 0)),            # b_all
                pl.BlockSpec((1, Hp), lambda b, t: (0, 0)),                # b_hn
            ],
            out_specs=pl.BlockSpec((Bb, t_chunk, Hp), lambda b, t: (b, t, 0)),
            scratch_shapes=[
                pltpu.VMEM((Bb, Hp), jnp.float32),                 # carried h
                pltpu.VMEM((t_chunk, Bb, 3 * Hp), jnp.float32),    # chunk gi
                pltpu.VMEM((t_chunk, Bb, Hp), jnp.float32),        # chunk hidden states
            ],
        ),
        compiler_params=pltpu.CompilerParams(
            dimension_semantics=("parallel", "arbitrary"),
            vmem_limit_bytes=vmem_limit,
        ),
        cost_estimate=cost,
    )(embed_tm, w_ih_p, w_hh_p, b_all, b_hn)

    out = out_p[:B, :T, :H]                       # [B, T, H] batch_first, no transpose
    hidden = out_p[:B, T - 1, :H][None, :, :]     # [1, B, H] == h after last real step
    return out, hidden


def init_params(key, vocab_len, emb_size, hidden_size):
    k_emb, k1, k2, k3, k4 = jax.random.split(key, 5)
    # nn.Embedding: N(0, 1); nn.GRU: U(-1/sqrt(H), 1/sqrt(H)). Deterministic, synthetic.
    s = 1.0 / jnp.sqrt(jnp.float32(hidden_size))
    return {
        "emb": jax.random.normal(k_emb, (vocab_len, emb_size), jnp.float32),
        "w_ih": jax.random.uniform(k1, (3 * hidden_size, emb_size), jnp.float32, -s, s),
        "w_hh": jax.random.uniform(k2, (3 * hidden_size, hidden_size), jnp.float32, -s, s),
        "b_ih": jax.random.uniform(k3, (3 * hidden_size,), jnp.float32, -s, s),
        "b_hh": jax.random.uniform(k4, (3 * hidden_size,), jnp.float32, -s, s),
    }


def reference_forward(x_ids, params):
    """Pure-JAX f32 reference mirroring torch.nn.GRU(batch_first=True)."""
    emb = jnp.take(params["emb"], x_ids, axis=0)          # [B, T, E]
    H = params["w_hh"].shape[1]
    w_ih_t = params["w_ih"].T
    w_hh_t = params["w_hh"].T
    b_ih = params["b_ih"]
    b_hh = params["b_hh"]

    def step(h, x_t):
        gi = jnp.dot(x_t, w_ih_t, precision=lax.Precision.HIGHEST) + b_ih
        gh = jnp.dot(h, w_hh_t, precision=lax.Precision.HIGHEST) + b_hh
        i_r, i_z, i_n = gi[:, :H], gi[:, H:2 * H], gi[:, 2 * H:]
        h_r, h_z, h_n = gh[:, :H], gh[:, H:2 * H], gh[:, 2 * H:]
        r = jax.nn.sigmoid(i_r + h_r)
        z = jax.nn.sigmoid(i_z + h_z)
        n = jnp.tanh(i_n + r * h_n)
        h_new = (1.0 - z) * n + z * h
        return h_new, h_new

    B = x_ids.shape[0]
    h0 = jnp.zeros((B, H), jnp.float32)
    h_last, outs = lax.scan(step, h0, jnp.transpose(emb, (1, 0, 2)))
    return jnp.transpose(outs, (1, 0, 2)), h_last[None]


if __name__ == "__main__":
    def run_case(key, vocab, emb, hid, b, t):
        k_params, k_ids = jax.random.split(key)
        params = init_params(k_params, vocab, emb, hid)
        x_ids = jax.random.randint(k_ids, (b, t), 0, vocab, dtype=jnp.int32)

        out, hidden = encoder_forward(x_ids, params)
        jax.block_until_ready((out, hidden))

        ref_out, ref_hidden = reference_forward(x_ids, params)
        assert out.shape == (b, t, hid) and hidden.shape == (1, b, hid)
        # bf16-in / f32-accumulate MXU path -> looser tolerance vs f32 reference.
        assert jnp.allclose(out, ref_out, atol=2e-2, rtol=2e-2)
        assert jnp.allclose(hidden, ref_hidden, atol=2e-2, rtol=2e-2)

    key = jax.random.PRNGKey(0)
    k1, k2 = jax.random.split(key)
    run_case(k1, vocab=20, emb=32, hid=32, b=2, t=8)     # small, chunk-divisible
    run_case(k2, vocab=20, emb=32, hid=32, b=3, t=11)    # ragged batch + time tail

    print("KERNEL_OK")
</pallas_src>

<mosaic_0001>
module attributes {stable_mosaic.version = 11 : i64} {
  func.func @gru_encoder_kernel(%arg0: i32, %arg1: i32, %arg2: memref<8x8x128xbf16, #tpu.memory_space<vmem>>, %arg3: memref<128x384xbf16, #tpu.memory_space<vmem>>, %arg4: memref<128x384xbf16, #tpu.memory_space<vmem>>, %arg5: memref<1x384xf32, #tpu.memory_space<vmem>>, %arg6: memref<1x128xf32, #tpu.memory_space<vmem>>, %arg7: memref<8x8x128xf32, #tpu.memory_space<vmem>>, %arg8: memref<8x128xf32, #tpu.memory_space<vmem>>, %arg9: memref<8x8x384xf32, #tpu.memory_space<vmem>>, %arg10: memref<8x8x128xf32, #tpu.memory_space<vmem>>) attributes {dimension_semantics = [#tpu.dimension_semantics<parallel>, #tpu.dimension_semantics<arbitrary>], iteration_bounds = array<i64: 1, 1>, scalar_prefetch = 0 : i64, scratch_operands = 3 : i64, tpu.core_type = #tpu.core_type<tc>, window_params = [{transform_indices = @transform_0, window_bounds = array<i64: 8, 8, 128>}, {pipeline_mode = #tpu.pipeline_mode<synchronous>, transform_indices = @transform_1, window_bounds = array<i64: 128, 384>}, {pipeline_mode = #tpu.pipeline_mode<synchronous>, transform_indices = @transform_2, window_bounds = array<i64: 128, 384>}, {pipeline_mode = #tpu.pipeline_mode<synchronous>, transform_indices = @transform_3, window_bounds = array<i64: 1, 384>}, {pipeline_mode = #tpu.pipeline_mode<synchronous>, transform_indices = @transform_4, window_bounds = array<i64: 1, 128>}, {transform_indices = @transform_5, window_bounds = array<i64: 8, 8, 128>}]} {
    %c0_i32 = arith.constant 0 : i32
    %0 = arith.cmpi eq, %arg1, %c0_i32 : i32
    %1 = arith.extui %0 : i1 to i32
    %c0_i32_0 = arith.constant 0 : i32
    %2 = arith.cmpi ne, %1, %c0_i32_0 : i32
    scf.if %2 {
      %cst_124 = arith.constant 0.000000e+00 : f32
      %346 = vector.broadcast %cst_124 : f32 to vector<8x128xf32>
      %c0_125 = arith.constant 0 : index
      %c0_126 = arith.constant 0 : index
      %347 = vector.load %arg8[%c0_125, %c0_126] : memref<8x128xf32, #tpu.memory_space<vmem>>, vector<8x128xf32>
      tpu.vector_store %arg8[%c0_125, %c0_126], %346 {strides = array<i32>} : memref<8x128xf32, #tpu.memory_space<vmem>>, vector<8x128xf32>,
    } else {
    }
    %c0 = arith.constant 0 : index
    %c0_1 = arith.constant 0 : index
    %c0_2 = arith.constant 0 : index
    %3 = vector.load %arg2[%c0, %c0_1, %c0_2] : memref<8x8x128xbf16, #tpu.memory_space<vmem>>, vector<8x8x128xbf16>
    %4 = vector.shape_cast %3 : vector<8x8x128xbf16> to vector<64x128xbf16>
    %c0_3 = arith.constant 0 : index
    %c0_4 = arith.constant 0 : index
    %5 = vector.load %arg3[%c0_3, %c0_4] : memref<128x384xbf16, #tpu.memory_space<vmem>>, vector<128x384xbf16>
    %cst = arith.constant dense<0.000000e+00> : vector<64x384xf32>
    %6 = tpu.matmul %4, %5, %cst {dimension_numbers = #tpu.dot_dimension_numbers<[1], [0], [0], [1], [0, 0, 1, 1], [], []>} : vector<64x128xbf16>, vector<128x384xbf16>, vector<64x384xf32> -> vector<64x384xf32>
    %c0_5 = arith.constant 0 : index
    %c0_6 = arith.constant 0 : index
    %7 = vector.load %arg5[%c0_5, %c0_6] : memref<1x384xf32, #tpu.memory_space<vmem>>, vector<1x384xf32>
    %8 = vector.broadcast %7 : vector<1x384xf32> to vector<64x384xf32>
    %9 = arith.addf %6, %8 : vector<64x384xf32>
    %10 = vector.shape_cast %9 : vector<64x384xf32> to vector<8x8x384xf32>
    %c0_7 = arith.constant 0 : index
    %c0_8 = arith.constant 0 : index
    %c0_9 = arith.constant 0 : index
    %11 = vector.load %arg9[%c0_7, %c0_8, %c0_9] : memref<8x8x384xf32, #tpu.memory_space<vmem>>, vector<8x8x384xf32>
    tpu.vector_store %arg9[%c0_7, %c0_8, %c0_9], %10 {strides = array<i32>} : memref<8x8x384xf32, #tpu.memory_space<vmem>>, vector<8x8x384xf32>,
    %c0_10 = arith.constant 0 : index
    %c0_11 = arith.constant 0 : index
    %12 = vector.load %arg4[%c0_10, %c0_11] : memref<128x384xbf16, #tpu.memory_space<vmem>>, vector<128x384xbf16>
    %c0_12 = arith.constant 0 : index
    %c0_13 = arith.constant 0 : index
    %13 = vector.load %arg6[%c0_12, %c0_13] : memref<1x128xf32, #tpu.memory_space<vmem>>, vector<1x128xf32>
    %14 = vector.shape_cast %13 : vector<1x128xf32> to vector<1x128xf32>
    %15 = vector.broadcast %14 : vector<1x128xf32> to vector<8x128xf32>
    %c0_14 = arith.constant 0 : index
    %c0_15 = arith.constant 0 : index
    %16 = vector.load %arg8[%c0_14, %c0_15] : memref<8x128xf32, #tpu.memory_space<vmem>>, vector<8x128xf32>
    %c0_i32_16 = arith.constant 0 : i32
    %17 = arith.truncf %16 : vector<8x128xf32> to vector<8x128xbf16>
    %cst_17 = arith.constant dense<0.000000e+00> : vector<8x384xf32>
    %18 = tpu.matmul %17, %12, %cst_17 {dimension_numbers = #tpu.dot_dimension_numbers<[1], [0], [0], [1], [0, 0, 1, 1], [], []>} : vector<8x128xbf16>, vector<128x384xbf16>, vector<8x384xf32> -> vector<8x384xf32>
    %19 = arith.index_cast %c0_i32_16 : i32 to index
    %c0_18 = arith.constant 0 : index
    %c0_19 = arith.constant 0 : index
    %20 = vector.load %arg9[%19, %c0_18, %c0_19] : memref<8x8x384xf32, #tpu.memory_space<vmem>>, vector<1x8x384xf32>
    %21 = vector.shape_cast %20 : vector<1x8x384xf32> to vector<8x384xf32>
    %22 = vector.extract_strided_slice %21 {offsets = [0, 0], sizes = [8, 128], strides = [1, 1]} : vector<8x384xf32> to vector<8x128xf32>
    %23 = vector.extract_strided_slice %18 {offsets = [0, 0], sizes = [8, 128], strides = [1, 1]} : vector<8x384xf32> to vector<8x128xf32>
    %24 = arith.addf %22, %23 : vector<8x128xf32>
    %25 = arith.negf %24 : vector<8x128xf32>
    %26 = math.exp %25 : vector<8x128xf32>
    %cst_20 = arith.constant 1.000000e+00 : f32
    %27 = vector.broadcast %cst_20 : f32 to vector<8x128xf32>
    %28 = arith.addf %27, %26 : vector<8x128xf32>
    %29 = arith.divf %27, %28 : vector<8x128xf32>
    %30 = vector.extract_strided_slice %21 {offsets = [0, 128], sizes = [8, 128], strides = [1, 1]} : vector<8x384xf32> to vector<8x128xf32>
    %31 = vector.extract_strided_slice %18 {offsets = [0, 128], sizes = [8, 128], strides = [1, 1]} : vector<8x384xf32> to vector<8x128xf32>
    %32 = arith.addf %30, %31 : vector<8x128xf32>
    %33 = arith.negf %32 : vector<8x128xf32>
    %34 = math.exp %33 : vector<8x128xf32>
    %cst_21 = arith.constant 1.000000e+00 : f32
    %35 = vector.broadcast %cst_21 : f32 to vector<8x128xf32>
    %36 = arith.addf %35, %34 : vector<8x128xf32>
    %37 = arith.divf %35, %36 : vector<8x128xf32>
    %38 = vector.extract_strided_slice %21 {offsets = [0, 256], sizes = [8, 128], strides = [1, 1]} : vector<8x384xf32> to vector<8x128xf32>
    %39 = vector.extract_strided_slice %18 {offsets = [0, 256], sizes = [8, 128], strides = [1, 1]} : vector<8x384xf32> to vector<8x128xf32>
    %40 = arith.addf %39, %15 : vector<8x128xf32>
    %41 = arith.mulf %29, %40 : vector<8x128xf32>
    %42 = arith.addf %38, %41 : vector<8x128xf32>
    %43 = math.tanh %42 : vector<8x128xf32>
    %cst_22 = arith.constant 1.000000e+00 : f32
    %44 = vector.broadcast %cst_22 : f32 to vector<8x128xf32>
    %45 = arith.subf %44, %37 : vector<8x128xf32>
    %46 = arith.mulf %45, %43 : vector<8x128xf32>
    %47 = arith.mulf %37, %16 : vector<8x128xf32>
    %48 = arith.addf %46, %47 : vector<8x128xf32>
    %49 = arith.index_cast %c0_i32_16 : i32 to index
    %c0_23 = arith.constant 0 : index
    %c0_24 = arith.constant 0 : index
    %50 = vector.load %arg10[%49, %c0_23, %c0_24] : memref<8x8x128xf32, #tpu.memory_space<vmem>>, vector<1x8x128xf32>
    %51 = vector.shape_cast %50 : vector<1x8x128xf32> to vector<8x128xf32>
    %52 = vector.shape_cast %48 : vector<8x128xf32> to vector<1x8x128xf32>
    tpu.vector_store %arg10[%49, %c0_23, %c0_24], %52 {strides = array<i32>} : memref<8x8x128xf32, #tpu.memory_space<vmem>>, vector<1x8x128xf32>,
    %c1_i32 = arith.constant 1 : i32
    %53 = arith.truncf %48 : vector<8x128xf32> to vector<8x128xbf16>
    %cst_25 = arith.constant dense<0.000000e+00> : vector<8x384xf32>
    %54 = tpu.matmul %53, %12, %cst_25 {dimension_numbers = #tpu.dot_dimension_numbers<[1], [0], [0], [1], [0, 0, 1, 1], [], []>} : vector<8x128xbf16>, vector<128x384xbf16>, vector<8x384xf32> -> vector<8x384xf32>
    %55 = arith.index_cast %c1_i32 : i32 to index
    %c0_26 = arith.constant 0 : index
    %c0_27 = arith.constant 0 : index
    %56 = vector.load %arg9[%55, %c0_26, %c0_27] : memref<8x8x384xf32, #tpu.memory_space<vmem>>, vector<1x8x384xf32>
    %57 = vector.shape_cast %56 : vector<1x8x384xf32> to vector<8x384xf32>
    %58 = vector.extract_strided_slice %57 {offsets = [0, 0], sizes = [8, 128], strides = [1, 1]} : vector<8x384xf32> to vector<8x128xf32>
    %59 = vector.extract_strided_slice %54 {offsets = [0, 0], sizes = [8, 128], strides = [1, 1]} : vector<8x384xf32> to vector<8x128xf32>
    %60 = arith.addf %58, %59 : vector<8x128xf32>
    %61 = arith.negf %60 : vector<8x128xf32>
    %62 = math.exp %61 : vector<8x128xf32>
    %cst_28 = arith.constant 1.000000e+00 : f32
    %63 = vector.broadcast %cst_28 : f32 to vector<8x128xf32>
    %64 = arith.addf %63, %62 : vector<8x128xf32>
    %65 = arith.divf %63, %64 : vector<8x128xf32>
    %66 = vector.extract_strided_slice %57 {offsets = [0, 128], sizes = [8, 128], strides = [1, 1]} : vector<8x384xf32> to vector<8x128xf32>
    %67 = vector.extract_strided_slice %54 {offsets = [0, 128], sizes = [8, 128], strides = [1, 1]} : vector<8x384xf32> to vector<8x128xf32>
    %68 = arith.addf %66, %67 : vector<8x128xf32>
    %69 = arith.negf %68 : vector<8x128xf32>
    %70 = math.exp %69 : vector<8x128xf32>
    %cst_29 = arith.constant 1.000000e+00 : f32
    %71 = vector.broadcast %cst_29 : f32 to vector<8x128xf32>
    %72 = arith.addf %71, %70 : vector<8x128xf32>
    %73 = arith.divf %71, %72 : vector<8x128xf32>
    %74 = vector.extract_strided_slice %57 {offsets = [0, 256], sizes = [8, 128], strides = [1, 1]} : vector<8x384xf32> to vector<8x128xf32>
    %75 = vector.extract_strided_slice %54 {offsets = [0, 256], sizes = [8, 128], strides = [1, 1]} : vector<8x384xf32> to vector<8x128xf32>
    %76 = arith.addf %75, %15 : vector<8x128xf32>
    %77 = arith.mulf %65, %76 : vector<8x128xf32>
    %78 = arith.addf %74, %77 : vector<8x128xf32>
    %79 = math.tanh %78 : vector<8x128xf32>
    %cst_30 = arith.constant 1.000000e+00 : f32
    %80 = vector.broadcast %cst_30 : f32 to vector<8x128xf32>
    %81 = arith.subf %80, %73 : vector<8x128xf32>
    %82 = arith.mulf %81, %79 : vector<8x128xf32>
    %83 = arith.mulf %73, %48 : vector<8x128xf32>
    %84 = arith.addf %82, %83 : vector<8x128xf32>
    %85 = arith.index_cast %c1_i32 : i32 to index
    %c0_31 = arith.constant 0 : index
    %c0_32 = arith.constant 0 : index
    %86 = vector.load %arg10[%85, %c0_31, %c0_32] : memref<8x8x128xf32, #tpu.memory_space<vmem>>, vector<1x8x128xf32>
    %87 = vector.shape_cast %86 : vector<1x8x128xf32> to vector<8x128xf32>
    %88 = vector.shape_cast %84 : vector<8x128xf32> to vector<1x8x128xf32>
    tpu.vector_store %arg10[%85, %c0_31, %c0_32], %88 {strides = array<i32>} : memref<8x8x128xf32, #tpu.memory_space<vmem>>, vector<1x8x128xf32>,
    %c2_i32 = arith.constant 2 : i32
    %89 = arith.truncf %84 : vector<8x128xf32> to vector<8x128xbf16>
    %cst_33 = arith.constant dense<0.000000e+00> : vector<8x384xf32>
    %90 = tpu.matmul %89, %12, %cst_33 {dimension_numbers = #tpu.dot_dimension_numbers<[1], [0], [0], [1], [0, 0, 1, 1], [], []>} : vector<8x128xbf16>, vector<128x384xbf16>, vector<8x384xf32> -> vector<8x384xf32>
    %91 = arith.index_cast %c2_i32 : i32 to index
    %c0_34 = arith.constant 0 : index
    %c0_35 = arith.constant 0 : index
    %92 = vector.load %arg9[%91, %c0_34, %c0_35] : memref<8x8x384xf32, #tpu.memory_space<vmem>>, vector<1x8x384xf32>
    %93 = vector.shape_cast %92 : vector<1x8x384xf32> to vector<8x384xf32>
    %94 = vector.extract_strided_slice %93 {offsets = [0, 0], sizes = [8, 128], strides = [1, 1]} : vector<8x384xf32> to vector<8x128xf32>
    %95 = vector.extract_strided_slice %90 {offsets = [0, 0], sizes = [8, 128], strides = [1, 1]} : vector<8x384xf32> to vector<8x128xf32>
    %96 = arith.addf %94, %95 : vector<8x128xf32>
    %97 = arith.negf %96 : vector<8x128xf32>
    %98 = math.exp %97 : vector<8x128xf32>
    %cst_36 = arith.constant 1.000000e+00 : f32
    %99 = vector.broadcast %cst_36 : f32 to vector<8x128xf32>
    %100 = arith.addf %99, %98 : vector<8x128xf32>
    %101 = arith.divf %99, %100 : vector<8x128xf32>
    %102 = vector.extract_strided_slice %93 {offsets = [0, 128], sizes = [8, 128], strides = [1, 1]} : vector<8x384xf32> to vector<8x128xf32>
    %103 = vector.extract_strided_slice %90 {offsets = [0, 128], sizes = [8, 128], strides = [1, 1]} : vector<8x384xf32> to vector<8x128xf32>
    %104 = arith.addf %102, %103 : vector<8x128xf32>
    %105 = arith.negf %104 : vector<8x128xf32>
    %106 = math.exp %105 : vector<8x128xf32>
    %cst_37 = arith.constant 1.000000e+00 : f32
    %107 = vector.broadcast %cst_37 : f32 to vector<8x128xf32>
    %108 = arith.addf %107, %106 : vector<8x128xf32>
    %109 = arith.divf %107, %108 : vector<8x128xf32>
    %110 = vector.extract_strided_slice %93 {offsets = [0, 256], sizes = [8, 128], strides = [1, 1]} : vector<8x384xf32> to vector<8x128xf32>
    %111 = vector.extract_strided_slice %90 {offsets = [0, 256], sizes = [8, 128], strides = [1, 1]} : vector<8x384xf32> to vector<8x128xf32>
    %112 = arith.addf %111, %15 : vector<8x128xf32>
    %113 = arith.mulf %101, %112 : vector<8x128xf32>
    %114 = arith.addf %110, %113 : vector<8x128xf32>
    %115 = math.tanh %114 : vector<8x128xf32>
    %cst_38 = arith.constant 1.000000e+00 : f32
    %116 = vector.broadcast %cst_38 : f32 to vector<8x128xf32>
    %117 = arith.subf %116, %109 : vector<8x128xf32>
    %118 = arith.mulf %117, %115 : vector<8x128xf32>
    %119 = arith.mulf %109, %84 : vector<8x128xf32>
    %120 = arith.addf %118, %119 : vector<8x128xf32>
    %121 = arith.index_cast %c2_i32 : i32 to index
    %c0_39 = arith.constant 0 : index
    %c0_40 = arith.constant 0 : index
    %122 = vector.load %arg10[%121, %c0_39, %c0_40] : memref<8x8x128xf32, #tpu.memory_space<vmem>>, vector<1x8x128xf32>
    %123 = vector.shape_cast %122 : vector<1x8x128xf32> to vector<8x128xf32>
    %124 = vector.shape_cast %120 : vector<8x128xf32> to vector<1x8x128xf32>
    tpu.vector_store %arg10[%121, %c0_39, %c0_40], %124 {strides = array<i32>} : memref<8x8x128xf32, #tpu.memory_space<vmem>>, vector<1x8x128xf32>,
    %c3_i32 = arith.constant 3 : i32
    %125 = arith.truncf %120 : vector<8x128xf32> to vector<8x128xbf16>
    %cst_41 = arith.constant dense<0.000000e+00> : vector<8x384xf32>
    %126 = tpu.matmul %125, %12, %cst_41 {dimension_numbers = #tpu.dot_dimension_numbers<[1], [0], [0], [1], [0, 0, 1, 1], [], []>} : vector<8x128xbf16>, vector<128x384xbf16>, vector<8x384xf32> -> vector<8x384xf32>
    %127 = arith.index_cast %c3_i32 : i32 to index
    %c0_42 = arith.constant 0 : index
    %c0_43 = arith.constant 0 : index
    %128 = vector.load %arg9[%127, %c0_42, %c0_43] : memref<8x8x384xf32, #tpu.memory_space<vmem>>, vector<1x8x384xf32>
    %129 = vector.shape_cast %128 : vector<1x8x384xf32> to vector<8x384xf32>
    %130 = vector.extract_strided_slice %129 {offsets = [0, 0], sizes = [8, 128], strides = [1, 1]} : vector<8x384xf32> to vector<8x128xf32>
    %131 = vector.extract_strided_slice %126 {offsets = [0, 0], sizes = [8, 128], strides = [1, 1]} : vector<8x384xf32> to vector<8x128xf32>
    %132 = arith.addf %130, %131 : vector<8x128xf32>
    %133 = arith.negf %132 : vector<8x128xf32>
    %134 = math.exp %133 : vector<8x128xf32>
    %cst_44 = arith.constant 1.000000e+00 : f32
    %135 = vector.broadcast %cst_44 : f32 to vector<8x128xf32>
    %136 = arith.addf %135, %134 : vector<8x128xf32>
    %137 = arith.divf %135, %136 : vector<8x128xf32>
    %138 = vector.extract_strided_slice %129 {offsets = [0, 128], sizes = [8, 128], strides = [1, 1]} : vector<8x384xf32> to vector<8x128xf32>
    %139 = vector.extract_strided_slice %126 {offsets = [0, 128], sizes = [8, 128], strides = [1, 1]} : vector<8x384xf32> to vector<8x128xf32>
    %140 = arith.addf %138, %139 : vector<8x128xf32>
    %141 = arith.negf %140 : vector<8x128xf32>
    %142 = math.exp %141 : vector<8x128xf32>
    %cst_45 = arith.constant 1.000000e+00 : f32
    %143 = vector.broadcast %cst_45 : f32 to vector<8x128xf32>
    %144 = arith.addf %143, %142 : vector<8x128xf32>
    %145 = arith.divf %143, %144 : vector<8x128xf32>
    %146 = vector.extract_strided_slice %129 {offsets = [0, 256], sizes = [8, 128], strides = [1, 1]} : vector<8x384xf32> to vector<8x128xf32>
    %147 = vector.extract_strided_slice %126 {offsets = [0, 256], sizes = [8, 128], strides = [1, 1]} : vector<8x384xf32> to vector<8x128xf32>
    %148 = arith.addf %147, %15 : vector<8x128xf32>
    %149 = arith.mulf %137, %148 : vector<8x128xf32>
    %150 = arith.addf %146, %149 : vector<8x128xf32>
    %151 = math.tanh %150 : vector<8x128xf32>
    %cst_46 = arith.constant 1.000000e+00 : f32
    %152 = vector.broadcast %cst_46 : f32 to vector<8x128xf32>
    %153 = arith.subf %152, %145 : vector<8x128xf32>
    %154 = arith.mulf %153, %151 : vector<8x128xf32>
    %155 = arith.mulf %145, %120 : vector<8x128xf32>
    %156 = arith.addf %154, %155 : vector<8x128xf32>
    %157 = arith.index_cast %c3_i32 : i32 to index
    %c0_47 = arith.constant 0 : index
    %c0_48 = arith.constant 0 : index
    %158 = vector.load %arg10[%157, %c0_47, %c0_48] : memref<8x8x128xf32, #tpu.memory_space<vmem>>, vector<1x8x128xf32>
    %159 = vector.shape_cast %158 : vector<1x8x128xf32> to vector<8x128xf32>
    %160 = vector.shape_cast %156 : vector<8x128xf32> to vector<1x8x128xf32>
    tpu.vector_store %arg10[%157, %c0_47, %c0_48], %160 {strides = array<i32>} : memref<8x8x128xf32, #tpu.memory_space<vmem>>, vector<1x8x128xf32>,
    %c4_i32 = arith.constant 4 : i32
    %161 = arith.truncf %156 : vector<8x128xf32> to vector<8x128xbf16>
    %cst_49 = arith.constant dense<0.000000e+00> : vector<8x384xf32>
    %162 = tpu.matmul %161, %12, %cst_49 {dimension_numbers = #tpu.dot_dimension_numbers<[1], [0], [0], [1], [0, 0, 1, 1], [], []>} : vector<8x128xbf16>, vector<128x384xbf16>, vector<8x384xf32> -> vector<8x384xf32>
    %163 = arith.index_cast %c4_i32 : i32 to index
    %c0_50 = arith.constant 0 : index
    %c0_51 = arith.constant 0 : index
    %164 = vector.load %arg9[%163, %c0_50, %c0_51] : memref<8x8x384xf32, #tpu.memory_space<vmem>>, vector<1x8x384xf32>
    %165 = vector.shape_cast %164 : vector<1x8x384xf32> to vector<8x384xf32>
    %166 = vector.extract_strided_slice %165 {offsets = [0, 0], sizes = [8, 128], strides = [1, 1]} : vector<8x384xf32> to vector<8x128xf32>
    %167 = vector.extract_strided_slice %162 {offsets = [0, 0], sizes = [8, 128], strides = [1, 1]} : vector<8x384xf32> to vector<8x128xf32>
    %168 = arith.addf %166, %167 : vector<8x128xf32>
    %169 = arith.negf %168 : vector<8x128xf32>
    %170 = math.exp %169 : vector<8x128xf32>
    %cst_52 = arith.constant 1.000000e+00 : f32
    %171 = vector.broadcast %cst_52 : f32 to vector<8x128xf32>
    %172 = arith.addf %171, %170 : vector<8x128xf32>
    %173 = arith.divf %171, %172 : vector<8x128xf32>
    %174 = vector.extract_strided_slice %165 {offsets = [0, 128], sizes = [8, 128], strides = [1, 1]} : vector<8x384xf32> to vector<8x128xf32>
    %175 = vector.extract_strided_slice %162 {offsets = [0, 128], sizes = [8, 128], strides = [1, 1]} : vector<8x384xf32> to vector<8x128xf32>
    %176 = arith.addf %174, %175 : vector<8x128xf32>
    %177 = arith.negf %176 : vector<8x128xf32>
    %178 = math.exp %177 : vector<8x128xf32>
    %cst_53 = arith.constant 1.000000e+00 : f32
    %179 = vector.broadcast %cst_53 : f32 to vector<8x128xf32>
    %180 = arith.addf %179, %178 : vector<8x128xf32>
    %181 = arith.divf %179, %180 : vector<8x128xf32>
    %182 = vector.extract_strided_slice %165 {offsets = [0, 256], sizes = [8, 128], strides = [1, 1]} : vector<8x384xf32> to vector<8x128xf32>
    %183 = vector.extract_strided_slice %162 {offsets = [0, 256], sizes = [8, 128], strides = [1, 1]} : vector<8x384xf32> to vector<8x128xf32>
    %184 = arith.addf %183, %15 : vector<8x128xf32>
    %185 = arith.mulf %173, %184 : vector<8x128xf32>
    %186 = arith.addf %182, %185 : vector<8x128xf32>
    %187 = math.tanh %186 : vector<8x128xf32>
    %cst_54 = arith.constant 1.000000e+00 : f32
    %188 = vector.broadcast %cst_54 : f32 to vector<8x128xf32>
    %189 = arith.subf %188, %181 : vector<8x128xf32>
    %190 = arith.mulf %189, %187 : vector<8x128xf32>
    %191 = arith.mulf %181, %156 : vector<8x128xf32>
    %192 = arith.addf %190, %191 : vector<8x128xf32>
    %193 = arith.index_cast %c4_i32 : i32 to index
    %c0_55 = arith.constant 0 : index
    %c0_56 = arith.constant 0 : index
    %194 = vector.load %arg10[%193, %c0_55, %c0_56] : memref<8x8x128xf32, #tpu.memory_space<vmem>>, vector<1x8x128xf32>
    %195 = vector.shape_cast %194 : vector<1x8x128xf32> to vector<8x128xf32>
    %196 = vector.shape_cast %192 : vector<8x128xf32> to vector<1x8x128xf32>
    tpu.vector_store %arg10[%193, %c0_55, %c0_56], %196 {strides = array<i32>} : memref<8x8x128xf32, #tpu.memory_space<vmem>>, vector<1x8x128xf32>,
    %c5_i32 = arith.constant 5 : i32
    %197 = arith.truncf %192 : vector<8x128xf32> to vector<8x128xbf16>
    %cst_57 = arith.constant dense<0.000000e+00> : vector<8x384xf32>
    %198 = tpu.matmul %197, %12, %cst_57 {dimension_numbers = #tpu.dot_dimension_numbers<[1], [0], [0], [1], [0, 0, 1, 1], [], []>} : vector<8x128xbf16>, vector<128x384xbf16>, vector<8x384xf32> -> vector<8x384xf32>
    %199 = arith.index_cast %c5_i32 : i32 to index
    %c0_58 = arith.constant 0 : index
    %c0_59 = arith.constant 0 : index
    %200 = vector.load %arg9[%199, %c0_58, %c0_59] : memref<8x8x384xf32, #tpu.memory_space<vmem>>, vector<1x8x384xf32>
    %201 = vector.shape_cast %200 : vector<1x8x384xf32> to vector<8x384xf32>
    %202 = vector.extract_strided_slice %201 {offsets = [0, 0], sizes = [8, 128], strides = [1, 1]} : vector<8x384xf32> to vector<8x128xf32>
    %203 = vector.extract_strided_slice %198 {offsets = [0, 0], sizes = [8, 128], strides = [1, 1]} : vector<8x384xf32> to vector<8x128xf32>
    %204 = arith.addf %202, %203 : vector<8x128xf32>
    %205 = arith.negf %204 : vector<8x128xf32>
    %206 = math.exp %205 : vector<8x128xf32>
    %cst_60 = arith.constant 1.000000e+00 : f32
    %207 = vector.broadcast %cst_60 : f32 to vector<8x128xf32>
    %208 = arith.addf %207, %206 : vector<8x128xf32>
    %209 = arith.divf %207, %208 : vector<8x128xf32>
    %210 = vector.extract_strided_slice %201 {offsets = [0, 128], sizes = [8, 128], strides = [1, 1]} : vector<8x384xf32> to vector<8x128xf32>
    %211 = vector.extract_strided_slice %198 {offsets = [0, 128], sizes = [8, 128], strides = [1, 1]} : vector<8x384xf32> to vector<8x128xf32>
    %212 = arith.addf %210, %211 : vector<8x128xf32>
    %213 = arith.negf %212 : vector<8x128xf32>
    %214 = math.exp %213 : vector<8x128xf32>
    %cst_61 = arith.constant 1.000000e+00 : f32
    %215 = vector.broadcast %cst_61 : f32 to vector<8x128xf32>
    %216 = arith.addf %215, %214 : vector<8x128xf32>
    %217 = arith.divf %215, %216 : vector<8x128xf32>
    %218 = vector.extract_strided_slice %201 {offsets = [0, 256], sizes = [8, 128], strides = [1, 1]} : vector<8x384xf32> to vector<8x128xf32>
    %219 = vector.extract_strided_slice %198 {offsets = [0, 256], sizes = [8, 128], strides = [1, 1]} : vector<8x384xf32> to vector<8x128xf32>
    %220 = arith.addf %219, %15 : vector<8x128xf32>
    %221 = arith.mulf %209, %220 : vector<8x128xf32>
    %222 = arith.addf %218, %221 : vector<8x128xf32>
    %223 = math.tanh %222 : vector<8x128xf32>
    %cst_62 = arith.constant 1.000000e+00 : f32
    %224 = vector.broadcast %cst_62 : f32 to vector<8x128xf32>
    %225 = arith.subf %224, %217 : vector<8x128xf32>
    %226 = arith.mulf %225, %223 : vector<8x128xf32>
    %227 = arith.mulf %217, %192 : vector<8x128xf32>
    %228 = arith.addf %226, %227 : vector<8x128xf32>
    %229 = arith.index_cast %c5_i32 : i32 to index
    %c0_63 = arith.constant 0 : index
    %c0_64 = arith.constant 0 : index
    %230 = vector.load %arg10[%229, %c0_63, %c0_64] : memref<8x8x128xf32, #tpu.memory_space<vmem>>, vector<1x8x128xf32>
    %231 = vector.shape_cast %230 : vector<1x8x128xf32> to vector<8x128xf32>
    %232 = vector.shape_cast %228 : vector<8x128xf32> to vector<1x8x128xf32>
    tpu.vector_store %arg10[%229, %c0_63, %c0_64], %232 {strides = array<i32>} : memref<8x8x128xf32, #tpu.memory_space<vmem>>, vector<1x8x128xf32>,
    %c6_i32 = arith.constant 6 : i32
    %233 = arith.truncf %228 : vector<8x128xf32> to vector<8x128xbf16>
    %cst_65 = arith.constant dense<0.000000e+00> : vector<8x384xf32>
    %234 = tpu.matmul %233, %12, %cst_65 {dimension_numbers = #tpu.dot_dimension_numbers<[1], [0], [0], [1], [0, 0, 1, 1], [], []>} : vector<8x128xbf16>, vector<128x384xbf16>, vector<8x384xf32> -> vector<8x384xf32>
    %235 = arith.index_cast %c6_i32 : i32 to index
    %c0_66 = arith.constant 0 : index
    %c0_67 = arith.constant 0 : index
    %236 = vector.load %arg9[%235, %c0_66, %c0_67] : memref<8x8x384xf32, #tpu.memory_space<vmem>>, vector<1x8x384xf32>
    %237 = vector.shape_cast %236 : vector<1x8x384xf32> to vector<8x384xf32>
    %238 = vector.extract_strided_slice %237 {offsets = [0, 0], sizes = [8, 128], strides = [1, 1]} : vector<8x384xf32> to vector<8x128xf32>
    %239 = vector.extract_strided_slice %234 {offsets = [0, 0], sizes = [8, 128], strides = [1, 1]} : vector<8x384xf32> to vector<8x128xf32>
    %240 = arith.addf %238, %239 : vector<8x128xf32>
    %241 = arith.negf %240 : vector<8x128xf32>
    %242 = math.exp %241 : vector<8x128xf32>
    %cst_68 = arith.constant 1.000000e+00 : f32
    %243 = vector.broadcast %cst_68 : f32 to vector<8x128xf32>
    %244 = arith.addf %243, %242 : vector<8x128xf32>
    %245 = arith.divf %243, %244 : vector<8x128xf32>
    %246 = vector.extract_strided_slice %237 {offsets = [0, 128], sizes = [8, 128], strides = [1, 1]} : vector<8x384xf32> to vector<8x128xf32>
    %247 = vector.extract_strided_slice %234 {offsets = [0, 128], sizes = [8, 128], strides = [1, 1]} : vector<8x384xf32> to vector<8x128xf32>
    %248 = arith.addf %246, %247 : vector<8x128xf32>
    %249 = arith.negf %248 : vector<8x128xf32>
    %250 = math.exp %249 : vector<8x128xf32>
    %cst_69 = arith.constant 1.000000e+00 : f32
    %251 = vector.broadcast %cst_69 : f32 to vector<8x128xf32>
    %252 = arith.addf %251, %250 : vector<8x128xf32>
    %253 = arith.divf %251, %252 : vector<8x128xf32>
    %254 = vector.extract_strided_slice %237 {offsets = [0, 256], sizes = [8, 128], strides = [1, 1]} : vector<8x384xf32> to vector<8x128xf32>
    %255 = vector.extract_strided_slice %234 {offsets = [0, 256], sizes = [8, 128], strides = [1, 1]} : vector<8x384xf32> to vector<8x128xf32>
    %256 = arith.addf %255, %15 : vector<8x128xf32>
    %257 = arith.mulf %245, %256 : vector<8x128xf32>
    %258 = arith.addf %254, %257 : vector<8x128xf32>
    %259 = math.tanh %258 : vector<8x128xf32>
    %cst_70 = arith.constant 1.000000e+00 : f32
    %260 = vector.broadcast %cst_70 : f32 to vector<8x128xf32>
    %261 = arith.subf %260, %253 : vector<8x128xf32>
    %262 = arith.mulf %261, %259 : vector<8x128xf32>
    %263 = arith.mulf %253, %228 : vector<8x128xf32>
    %264 = arith.addf %262, %263 : vector<8x128xf32>
    %265 = arith.index_cast %c6_i32 : i32 to index
    %c0_71 = arith.constant 0 : index
    %c0_72 = arith.constant 0 : index
    %266 = vector.load %arg10[%265, %c0_71, %c0_72] : memref<8x8x128xf32, #tpu.memory_space<vmem>>, vector<1x8x128xf32>
    %267 = vector.shape_cast %266 : vector<1x8x128xf32> to vector<8x128xf32>
    %268 = vector.shape_cast %264 : vector<8x128xf32> to vector<1x8x128xf32>
    tpu.vector_store %arg10[%265, %c0_71, %c0_72], %268 {strides = array<i32>} : memref<8x8x128xf32, #tpu.memory_space<vmem>>, vector<1x8x128xf32>,
    %c7_i32 = arith.constant 7 : i32
    %269 = arith.truncf %264 : vector<8x128xf32> to vector<8x128xbf16>
    %cst_73 = arith.constant dense<0.000000e+00> : vector<8x384xf32>
    %270 = tpu.matmul %269, %12, %cst_73 {dimension_numbers = #tpu.dot_dimension_numbers<[1], [0], [0], [1], [0, 0, 1, 1], [], []>} : vector<8x128xbf16>, vector<128x384xbf16>, vector<8x384xf32> -> vector<8x384xf32>
    %271 = arith.index_cast %c7_i32 : i32 to index
    %c0_74 = arith.constant 0 : index
    %c0_75 = arith.constant 0 : index
    %272 = vector.load %arg9[%271, %c0_74, %c0_75] : memref<8x8x384xf32, #tpu.memory_space<vmem>>, vector<1x8x384xf32>
    %273 = vector.shape_cast %272 : vector<1x8x384xf32> to vector<8x384xf32>
    %274 = vector.extract_strided_slice %273 {offsets = [0, 0], sizes = [8, 128], strides = [1, 1]} : vector<8x384xf32> to vector<8x128xf32>
    %275 = vector.extract_strided_slice %270 {offsets = [0, 0], sizes = [8, 128], strides = [1, 1]} : vector<8x384xf32> to vector<8x128xf32>
    %276 = arith.addf %274, %275 : vector<8x128xf32>
    %277 = arith.negf %276 : vector<8x128xf32>
    %278 = math.exp %277 : vector<8x128xf32>
    %cst_76 = arith.constant 1.000000e+00 : f32
    %279 = vector.broadcast %cst_76 : f32 to vector<8x128xf32>
    %280 = arith.addf %279, %278 : vector<8x128xf32>
    %281 = arith.divf %279, %280 : vector<8x128xf32>
    %282 = vector.extract_strided_slice %273 {offsets = [0, 128], sizes = [8, 128], strides = [1, 1]} : vector<8x384xf32> to vector<8x128xf32>
    %283 = vector.extract_strided_slice %270 {offsets = [0, 128], sizes = [8, 128], strides = [1, 1]} : vector<8x384xf32> to vector<8x128xf32>
    %284 = arith.addf %282, %283 : vector<8x128xf32>
    %285 = arith.negf %284 : vector<8x128xf32>
    %286 = math.exp %285 : vector<8x128xf32>
    %cst_77 = arith.constant 1.000000e+00 : f32
    %287 = vector.broadcast %cst_77 : f32 to vector<8x128xf32>
    %288 = arith.addf %287, %286 : vector<8x128xf32>
    %289 = arith.divf %287, %288 : vector<8x128xf32>
    %290 = vector.extract_strided_slice %273 {offsets = [0, 256], sizes = [8, 128], strides = [1, 1]} : vector<8x384xf32> to vector<8x128xf32>
    %291 = vector.extract_strided_slice %270 {offsets = [0, 256], sizes = [8, 128], strides = [1, 1]} : vector<8x384xf32> to vector<8x128xf32>
    %292 = arith.addf %291, %15 : vector<8x128xf32>
    %293 = arith.mulf %281, %292 : vector<8x128xf32>
    %294 = arith.addf %290, %293 : vector<8x128xf32>
    %295 = math.tanh %294 : vector<8x128xf32>
    %cst_78 = arith.constant 1.000000e+00 : f32
    %296 = vector.broadcast %cst_78 : f32 to vector<8x128xf32>
    %297 = arith.subf %296, %289 : vector<8x128xf32>
    %298 = arith.mulf %297, %295 : vector<8x128xf32>
    %299 = arith.mulf %289, %264 : vector<8x128xf32>
    %300 = arith.addf %298, %299 : vector<8x128xf32>
    %301 = arith.index_cast %c7_i32 : i32 to index
    %c0_79 = arith.constant 0 : index
    %c0_80 = arith.constant 0 : index
    %302 = vector.load %arg10[%301, %c0_79, %c0_80] : memref<8x8x128xf32, #tpu.memory_space<vmem>>, vector<1x8x128xf32>
    %303 = vector.shape_cast %302 : vector<1x8x128xf32> to vector<8x128xf32>
    %304 = vector.shape_cast %300 : vector<8x128xf32> to vector<1x8x128xf32>
    tpu.vector_store %arg10[%301, %c0_79, %c0_80], %304 {strides = array<i32>} : memref<8x8x128xf32, #tpu.memory_space<vmem>>, vector<1x8x128xf32>,
    %c8_i32 = arith.constant 8 : i32
    %c0_81 = arith.constant 0 : index
    %c0_82 = arith.constant 0 : index
    %305 = vector.load %arg8[%c0_81, %c0_82] : memref<8x128xf32, #tpu.memory_space<vmem>>, vector<8x128xf32>
    tpu.vector_store %arg8[%c0_81, %c0_82], %300 {strides = array<i32>} : memref<8x128xf32, #tpu.memory_space<vmem>>, vector<8x128xf32>,
    %c0_83 = arith.constant 0 : index
    %c0_84 = arith.constant 0 : index
    %c0_85 = arith.constant 0 : index
    %306 = vector.load %arg10[%c0_83, %c0_84, %c0_85] : memref<8x8x128xf32, #tpu.memory_space<vmem>>, vector<1x8x128xf32>
    %307 = vector.shape_cast %306 : vector<1x8x128xf32> to vector<8x128xf32>
    %c0_86 = arith.constant 0 : index
    %c0_87 = arith.constant 0 : index
    %c0_88 = arith.constant 0 : index
    %308 = vector.load %arg7[%c0_86, %c0_87, %c0_88] : memref<8x8x128xf32, #tpu.memory_space<vmem>>, vector<8x1x128xf32>
    %309 = vector.shape_cast %308 : vector<8x1x128xf32> to vector<8x128xf32>
    %310 = vector.shape_cast %307 : vector<8x128xf32> to vector<8x1x128xf32>
    tpu.vector_store %arg7[%c0_86, %c0_87, %c0_88], %310 {strides = array<i32>} : memref<8x8x128xf32, #tpu.memory_space<vmem>>, vector<8x1x128xf32>,
    %c1 = arith.constant 1 : index
    %c0_89 = arith.constant 0 : index
    %c0_90 = arith.constant 0 : index
    %311 = vector.load %arg10[%c1, %c0_89, %c0_90] : memref<8x8x128xf32, #tpu.memory_space<vmem>>, vector<1x8x128xf32>
    %312 = vector.shape_cast %311 : vector<1x8x128xf32> to vector<8x128xf32>
    %c0_91 = arith.constant 0 : index
    %c1_92 = arith.constant 1 : index
    %c0_93 = arith.constant 0 : index
    %313 = vector.load %arg7[%c0_91, %c1_92, %c0_93] : memref<8x8x128xf32, #tpu.memory_space<vmem>>, vector<8x1x128xf32>
    %314 = vector.shape_cast %313 : vector<8x1x128xf32> to vector<8x128xf32>
    %315 = vector.shape_cast %312 : vector<8x128xf32> to vector<8x1x128xf32>
    tpu.vector_store %arg7[%c0_91, %c1_92, %c0_93], %315 {strides = array<i32>} : memref<8x8x128xf32, #tpu.memory_space<vmem>>, vector<8x1x128xf32>,
    %c2 = arith.constant 2 : index
    %c0_94 = arith.constant 0 : index
    %c0_95 = arith.constant 0 : index
    %316 = vector.load %arg10[%c2, %c0_94, %c0_95] : memref<8x8x128xf32, #tpu.memory_space<vmem>>, vector<1x8x128xf32>
    %317 = vector.shape_cast %316 : vector<1x8x128xf32> to vector<8x128xf32>
    %c0_96 = arith.constant 0 : index
    %c2_97 = arith.constant 2 : index
    %c0_98 = arith.constant 0 : index
    %318 = vector.load %arg7[%c0_96, %c2_97, %c0_98] : memref<8x8x128xf32, #tpu.memory_space<vmem>>, vector<8x1x128xf32>
    %319 = vector.shape_cast %318 : vector<8x1x128xf32> to vector<8x128xf32>
    %320 = vector.shape_cast %317 : vector<8x128xf32> to vector<8x1x128xf32>
    tpu.vector_store %arg7[%c0_96, %c2_97, %c0_98], %320 {strides = array<i32>} : memref<8x8x128xf32, #tpu.memory_space<vmem>>, vector<8x1x128xf32>,
    %c3 = arith.constant 3 : index
    %c0_99 = arith.constant 0 : index
    %c0_100 = arith.constant 0 : index
    %321 = vector.load %arg10[%c3, %c0_99, %c0_100] : memref<8x8x128xf32, #tpu.memory_space<vmem>>, vector<1x8x128xf32>
    %322 = vector.shape_cast %321 : vector<1x8x128xf32> to vector<8x128xf32>
    %c0_101 = arith.constant 0 : index
    %c3_102 = arith.constant 3 : index
    %c0_103 = arith.constant 0 : index
    %323 = vector.load %arg7[%c0_101, %c3_102, %c0_103] : memref<8x8x128xf32, #tpu.memory_space<vmem>>, vector<8x1x128xf32>
    %324 = vector.shape_cast %323 : vector<8x1x128xf32> to vector<8x128xf32>
    %325 = vector.shape_cast %322 : vector<8x128xf32> to vector<8x1x128xf32>
    tpu.vector_store %arg7[%c0_101, %c3_102, %c0_103], %325 {strides = array<i32>} : memref<8x8x128xf32, #tpu.memory_space<vmem>>, vector<8x1x128xf32>,
    %c4 = arith.constant 4 : index
    %c0_104 = arith.constant 0 : index
    %c0_105 = arith.constant 0 : index
    %326 = vector.load %arg10[%c4, %c0_104, %c0_105] : memref<8x8x128xf32, #tpu.memory_space<vmem>>, vector<1x8x128xf32>
    %327 = vector.shape_cast %326 : vector<1x8x128xf32> to vector<8x128xf32>
    %c0_106 = arith.constant 0 : index
    %c4_107 = arith.constant 4 : index
    %c0_108 = arith.constant 0 : index
    %328 = vector.load %arg7[%c0_106, %c4_107, %c0_108] : memref<8x8x128xf32, #tpu.memory_space<vmem>>, vector<8x1x128xf32>
    %329 = vector.shape_cast %328 : vector<8x1x128xf32> to vector<8x128xf32>
    %330 = vector.shape_cast %327 : vector<8x128xf32> to vector<8x1x128xf32>
    tpu.vector_store %arg7[%c0_106, %c4_107, %c0_108], %330 {strides = array<i32>} : memref<8x8x128xf32, #tpu.memory_space<vmem>>, vector<8x1x128xf32>,
    %c5 = arith.constant 5 : index
    %c0_109 = arith.constant 0 : index
    %c0_110 = arith.constant 0 : index
    %331 = vector.load %arg10[%c5, %c0_109, %c0_110] : memref<8x8x128xf32, #tpu.memory_space<vmem>>, vector<1x8x128xf32>
    %332 = vector.shape_cast %331 : vector<1x8x128xf32> to vector<8x128xf32>
    %c0_111 = arith.constant 0 : index
    %c5_112 = arith.constant 5 : index
    %c0_113 = arith.constant 0 : index
    %333 = vector.load %arg7[%c0_111, %c5_112, %c0_113] : memref<8x8x128xf32, #tpu.memory_space<vmem>>, vector<8x1x128xf32>
    %334 = vector.shape_cast %333 : vector<8x1x128xf32> to vector<8x128xf32>
    %335 = vector.shape_cast %332 : vector<8x128xf32> to vector<8x1x128xf32>
    tpu.vector_store %arg7[%c0_111, %c5_112, %c0_113], %335 {strides = array<i32>} : memref<8x8x128xf32, #tpu.memory_space<vmem>>, vector<8x1x128xf32>,
    %c6 = arith.constant 6 : index
    %c0_114 = arith.constant 0 : index
    %c0_115 = arith.constant 0 : index
    %336 = vector.load %arg10[%c6, %c0_114, %c0_115] : memref<8x8x128xf32, #tpu.memory_space<vmem>>, vector<1x8x128xf32>
    %337 = vector.shape_cast %336 : vector<1x8x128xf32> to vector<8x128xf32>
    %c0_116 = arith.constant 0 : index
    %c6_117 = arith.constant 6 : index
    %c0_118 = arith.constant 0 : index
    %338 = vector.load %arg7[%c0_116, %c6_117, %c0_118] : memref<8x8x128xf32, #tpu.memory_space<vmem>>, vector<8x1x128xf32>
    %339 = vector.shape_cast %338 : vector<8x1x128xf32> to vector<8x128xf32>
    %340 = vector.shape_cast %337 : vector<8x128xf32> to vector<8x1x128xf32>
    tpu.vector_store %arg7[%c0_116, %c6_117, %c0_118], %340 {strides = array<i32>} : memref<8x8x128xf32, #tpu.memory_space<vmem>>, vector<8x1x128xf32>,
    %c7 = arith.constant 7 : index
    %c0_119 = arith.constant 0 : index
    %c0_120 = arith.constant 0 : index
    %341 = vector.load %arg10[%c7, %c0_119, %c0_120] : memref<8x8x128xf32, #tpu.memory_space<vmem>>, vector<1x8x128xf32>
    %342 = vector.shape_cast %341 : vector<1x8x128xf32> to vector<8x128xf32>
    %c0_121 = arith.constant 0 : index
    %c7_122 = arith.constant 7 : index
    %c0_123 = arith.constant 0 : index
    %343 = vector.load %arg7[%c0_121, %c7_122, %c0_123] : memref<8x8x128xf32, #tpu.memory_space<vmem>>, vector<8x1x128xf32>
    %344 = vector.shape_cast %343 : vector<8x1x128xf32> to vector<8x128xf32>
    %345 = vector.shape_cast %342 : vector<8x128xf32> to vector<8x1x128xf32>
    tpu.vector_store %arg7[%c0_121, %c7_122, %c0_123], %345 {strides = array<i32>} : memref<8x8x128xf32, #tpu.memory_space<vmem>>, vector<8x1x128xf32>,
    return
  }
  func.func @transform_0(%arg0: i32, %arg1: i32) -> (i32, i32, i32) {
    %c0_i32 = arith.constant 0 : i32
    %c0_i32_0 = arith.constant 0 : i32
    return %arg1, %arg0, %c0_i32 : i32, i32, i32
  }
  func.func @transform_1(%arg0: i32, %arg1: i32) -> (i32, i32) {
    %c0_i32 = arith.constant 0 : i32
    %c0_i32_0 = arith.constant 0 : i32
    %c0_i32_1 = arith.constant 0 : i32
    return %c0_i32, %c0_i32_0 : i32, i32
  }
  func.func @transform_2(%arg0: i32, %arg1: i32) -> (i32, i32) {
    %c0_i32 = arith.constant 0 : i32
    %c0_i32_0 = arith.constant 0 : i32
    %c0_i32_1 = arith.constant 0 : i32
    return %c0_i32, %c0_i32_0 : i32, i32
  }
  func.func @transform_3(%arg0: i32, %arg1: i32) -> (i32, i32) {
    %c0_i32 = arith.constant 0 : i32
    %c0_i32_0 = arith.constant 0 : i32
    %c0_i32_1 = arith.constant 0 : i32
    return %c0_i32, %c0_i32_0 : i32, i32
  }
  func.func @transform_4(%arg0: i32, %arg1: i32) -> (i32, i32) {
    %c0_i32 = arith.constant 0 : i32
    %c0_i32_0 = arith.constant 0 : i32
    %c0_i32_1 = arith.constant 0 : i32
    return %c0_i32, %c0_i32_0 : i32, i32
  }
  func.func @transform_5(%arg0: i32, %arg1: i32) -> (i32, i32, i32) {
    %c0_i32 = arith.constant 0 : i32
    %c0_i32_0 = arith.constant 0 : i32
    return %arg0, %arg1, %c0_i32 : i32, i32, i32
  }
}

</mosaic_0001>

<bundles_post_ra>
// kernel: encoder_forward.1
= control target key start
LH: loop header
LB: loop body
LE: loop exit
PB: predicated region body
PF: predicated region fallthrough
CT: control target
= control target key end

     0   :  { %v3566_v1 = vmov 0   ;;  %v3568_v34 = vmov 0.0   ;;  %vm2533_vm0 = vmmov 0   ;;  %v2534_v53 = vmov 0.0|0.0   ;;  %s3560_s1 = inlined_call_operand.vmem [shape: bf16[128,384], index: 1, kind: input, shape index: {}]   ;;  %s3561_s0 = inlined_call_operand.vmem [shape: bf16[8,8,128], index: 0, kind: input, shape index: {}]   ;;  %s3562_s2 = inlined_call_operand.vmem [shape: bf16[128,384], index: 2, kind: input, shape index: {}]   ;;  %s3563_s3 = inlined_call_operand.vmem [shape: f32[1,384], index: 3, kind: input, shape index: {}]   ;;  %s3564_s4 = inlined_call_operand.vmem [shape: f32[1,128], index: 4, kind: input, shape index: {}]   ;;  %s3565_s5 = inlined_call_operand.vmem [shape: f32[8,8,128], index: 5, kind: output, shape index: {}]  }
   0x1   :  { %v2358_v0 = vld [vmem:[%s3560_s1 + $0x4] ss:$12 sps:$4 sm:$0xff]   ;;  %267 = vmatprep.mubr.bf16.mxu0 %v3566_v1  ;;  %v2360_v2 = vld [vmem:[%s3560_s1] ss:$12 sps:$4 sm:$0xff]   ;;  %v2361_v3 = vld [vmem:[%s3560_s1 + $0x1c] ss:$12 sps:$4 sm:$0xff]   ;;  %v68_v55 = vlaneseq }
   0x2   :  { %235 = vmatprep.subr.bf16.mxu0 %v2358_v0  ;;  %v2363_v4 = vld [vmem:[%s3560_s1 + $0x18] ss:$12 sps:$4 sm:$0xff]   ;;  %v2364_v5 = vld [vmem:[%s3560_s1 + $0x34] ss:$12 sps:$4 sm:$0xff]   ;;  %v2366_v6 = vld [vmem:[%s3560_s1 + $0x30] ss:$12 sps:$4 sm:$0xff]  }
   0x3   :  { %236 = vmatpush1.bf16.msra.mxu0 %v2360_v2  ;;  %v2367_v7 = vld [vmem:[%s3560_s1 + $0x4c] ss:$12 sps:$4 sm:$0xff]   ;;  %v2378_v8 = vld [vmem:[%s3560_s1 + $0x8] ss:$12 sps:$4 sm:$0xff]   ;;  %v2370_v10 = vld [vmem:[%s3560_s1 + $0x64] ss:$12 sps:$4 sm:$0xff]  }
   0x4   :  { %237 = vmatprep.subr.bf16.mxu0 %v2361_v3  ;;  %v2369_v9 = vld [vmem:[%s3560_s1 + $0x48] ss:$12 sps:$4 sm:$0xff]   ;;  %2169 = vmatprep.subr.bf16.mxu1 %v2378_v8  ;;  %v2382_v11 = vld [vmem:[%s3560_s1 + $0x20] ss:$12 sps:$4 sm:$0xff]   ;;  %v2385_v13 = vld [vmem:[%s3560_s1 + $0x38] ss:$12 sps:$4 sm:$0xff]  }
   0x5   :  { %2170 = vmatpush3.bf16.msra.mxu1 %v2378_v8  ;;  %v2384_v12 = vld [vmem:[%s3561_s0] sm:$0xff]   ;;  %v2373_v15 = vld [vmem:[%s3560_s1 + $0x7c] ss:$12 sps:$4 sm:$0xff]   ;;  %v2380_v21 = vld [vmem:[%s3560_s1 + $0xac] ss:$12 sps:$4 sm:$0xff]   ;;  %v2846_v56 = vshrl.u32 %v68_v55, 7 }
   0x6   :  { %2171 = vmatprep.subr.bf16.mxu1 %v2382_v11  ;;  %v2372_v14 = vld [vmem:[%s3560_s1 + $0x60] ss:$12 sps:$4 sm:$0xff]   ;;  %2185 = vmatprep.mubr.bf16.mxu1 %v2384_v12  ;;  %v2389_v16 = vld [vmem:[%s3560_s1 + $0x50] ss:$12 sps:$4 sm:$0xff]   ;;  %v2375_v17 = vld [vmem:[%s3560_s1 + $0x78] ss:$12 sps:$4 sm:$0xff]  }
   0x7   :  { %238 = vmatpush1.bf16.msra.mxu0 %v2363_v4  ;;  %v2376_v18 = vld [vmem:[%s3560_s1 + $0x94] ss:$12 sps:$4 sm:$0xff]   ;;  %v2379_v20 = vld [vmem:[%s3560_s1 + $0x90] ss:$12 sps:$4 sm:$0xff]   ;;  %v2403_v25 = vld [vmem:[%s3560_s1 + $0x98] ss:$12 sps:$4 sm:$0xff]  }
   0x8   :  { %239 = vmatprep.subr.bf16.mxu0 %v2364_v5  ;;  %v2394_v19 = vld [vmem:[%s3560_s1 + $0x68] ss:$12 sps:$4 sm:$0xff]   ;;  %v2398_v22 = vld [vmem:[%s3560_s1 + $0x80] ss:$12 sps:$4 sm:$0xff]   ;;  %v2639_v24 = vld [vmem:[%s3562_s2 + $0x4] ss:$12 sps:$4 sm:$0xff]  }
   0x9   :  { %2172 = vmatpush3.bf16.msra.mxu1 %v2382_v11  ;;  %v2383_v23 = vld [vmem:[%s3560_s1 + $0xa8] ss:$12 sps:$4 sm:$0xff]   ;;  %v2647_v26 = vld [vmem:[%s3562_s2] ss:$12 sps:$4 sm:$0xff]   ;;  %v2407_v28 = vld [vmem:[%s3560_s1 + $0xb0] ss:$12 sps:$4 sm:$0xff]  }
   0xa   :  { %2173 = vmatprep.subr.bf16.mxu1 %v2385_v13  ;;  %v2653_v27 = vld [vmem:[%s3562_s2 + $0x1c] ss:$12 sps:$4 sm:$0xff]   ;;  %v2662_v29 = vld [vmem:[%s3562_s2 + $0x18] ss:$12 sps:$4 sm:$0xff]   ;;  %v2669_v30 = vld [vmem:[%s3562_s2 + $0x34] ss:$12 sps:$4 sm:$0xff]  }
   0xb   :  { %240 = vmatpush1.bf16.msra.mxu0 %v2366_v6  ;;  %v2393_v31 = vld [vmem:[%s3561_s0 + $0x8] sm:$0xff]   ;;  %v2678_v32 = vld [vmem:[%s3562_s2 + $0x30] ss:$12 sps:$4 sm:$0xff]   ;;  %v2731_v42 = vld [vmem:[%s3562_s2 + $0x38] ss:$12 sps:$4 sm:$0xff]   ;;  %v70_v57 = vsub.s32 0, %v2846_v56 }
   0xc   :  { %241 = vmatprep.subr.bf16.mxu0 %v2367_v7  ;;  %v2684_v33 = vld [vmem:[%s3562_s2 + $0x4c] ss:$12 sps:$4 sm:$0xff]   ;;  %v2690_v35 = vld [vmem:[%s3562_s2 + $0x8] ss:$12 sps:$4 sm:$0xff]   ;;  %v2706_v38 = vld [vmem:[%s3562_s2 + $0x64] ss:$12 sps:$4 sm:$0xff]  }
   0xd   :  { %2174 = vmatpush3.bf16.msra.mxu1 %v2385_v13  ;;  %v2696_v36 = vld [vmem:[%s3562_s2 + $0x48] ss:$12 sps:$4 sm:$0xff]   ;;  %v2712_v39 = vld [vmem:[%s3562_s2 + $0x20] ss:$12 sps:$4 sm:$0xff]   ;;  %v2411_v43 = vld [vmem:[%s3561_s0 + $0x18] sm:$0xff]   ;;  %v74_v59 = vsub.s32 1, %v2846_v56 }
   0xe   :  { %2175 = vmatprep.subr.bf16.mxu1 %v2389_v16  ;;  %v2402_v37 = vld [vmem:[%s3561_s0 + $0x10] sm:$0xff]   ;;  %v2719_v40 = vld [vmem:[%s3562_s2 + $0x60] ss:$12 sps:$4 sm:$0xff]   ;;  %v2725_v41 = vld [vmem:[%s3562_s2 + $0x7c] ss:$12 sps:$4 sm:$0xff]   ;;  %v78_v4 = vsub.s32 2, %v2846_v56 }
   0xf   :  { %242 = vmatpush1.bf16.msra.mxu0 %v2369_v9  ;;  %v2741_v44 = vld [vmem:[%s3562_s2 + $0x78] ss:$12 sps:$4 sm:$0xff]   ;;  %v2748_v45 = vld [vmem:[%s3562_s2 + $0x94] ss:$12 sps:$4 sm:$0xff]   ;;  %v2754_v46 = vld [vmem:[%s3562_s2 + $0x50] ss:$12 sps:$4 sm:$0xff]  }
  0x10   :  { %243 = vmatprep.subr.bf16.mxu0 %v2370_v10  ;;  %v2763_v47 = vld [vmem:[%s3562_s2 + $0x90] ss:$12 sps:$4 sm:$0xff]   ;;  %v2769_v48 = vld [vmem:[%s3562_s2 + $0xac] ss:$12 sps:$4 sm:$0xff]   ;;  %v2775_v49 = vld [vmem:[%s3562_s2 + $0x68] ss:$12 sps:$4 sm:$0xff]  }
  0x11   :  { %2176 = vmatpush3.bf16.msra.mxu1 %v2389_v16  ;;  %v2782_v50 = vld [vmem:[%s3562_s2 + $0xa8] ss:$12 sps:$4 sm:$0xff]   ;;  %v2790_v51 = vld [vmem:[%s3562_s2 + $0x80] ss:$12 sps:$4 sm:$0xff]   ;;  %v2799_v52 = vld [vmem:[%s3562_s2 + $0x98] ss:$12 sps:$4 sm:$0xff]  }
  0x12   :  { %2177 = vmatprep.subr.bf16.mxu1 %v2394_v19  ;;  %v2809_v54 = vld [vmem:[%s3562_s2 + $0xb0] ss:$12 sps:$4 sm:$0xff]   ;;  %v66_v58 = vld [vmem:[%s3563_s3] sm:$0x7] }
  0x13   :  { %244 = vmatpush1.bf16.msra.mxu0 %v2372_v14  ;;  %v71_v61 = vrot.slane %v66_v58, %v70_v57  ;;  %v75_v63 = vrot.slane %v66_v58, %v74_v59  ;;  %v2858_v6 = vrot.slane %v66_v58, %v78_v4 }
  0x14   :  { %245 = vmatprep.subr.bf16.mxu0 %v2373_v15 }
  0x15   :  { %2178 = vmatpush3.bf16.msra.mxu1 %v2394_v19 }
  0x16   :  { %2179 = vmatprep.subr.bf16.mxu1 %v2398_v22 }
  0x17   :  { %246 = vmatpush1.bf16.msra.mxu0 %v2375_v17 }
  0x18   :  { %247 = vmatprep.subr.bf16.mxu0 %v2376_v18 }
  0x19   :  { %2180 = vmatpush3.bf16.msra.mxu1 %v2398_v22 }
  0x1a   :  { %2181 = vmatprep.subr.bf16.mxu1 %v2403_v25 }
  0x1b   :  { %248 = vmatpush1.bf16.msra.mxu0 %v2379_v20 }
  0x1c   :  { %249 = vmatprep.subr.bf16.mxu0 %v2380_v21 }
  0x1d   :  { %2182 = vmatpush3.bf16.msra.mxu1 %v2403_v25 }
  0x1e   :  { %2183 = vmatprep.subr.bf16.mxu1 %v2407_v28 }
  0x1f   :  { %250 = vmatpush1.bf16.msra.mxu0 %v2383_v23 }
  0x20   :  { %566 = vmatprep.subr.bf16.mxu0 %v2639_v24 }
  0x21   :  { %2184 = vmatpush3.bf16.msra.mxu1 %v2407_v28 }
  0x22   :  { %268 = vmatmul.mubr.bf16.vlgmr.msra.gmra.mrb[0].mxu0 %v2384_v12  ;;  %2193 = vmatprep.subr.bf16.mxu1 %v3568_v34 }
  0x23   :  { %567 = vmatpush1.bf16.msra.mxu0 %v2647_v26  ;;  %277 = vmatprep.mubr.bf16.mxu0 %v3566_v1 }
  0x24   :  { %568 = vmatprep.subr.bf16.mxu0 %v2653_v27  ;;  %2186 = vmatmul.mubr.bf16.vlgmr.msra.gmra.mrb[0].mxu1 %v2393_v31 }
  0x25   :  { %2194 = vmatpush3.bf16.msra.mxu1 %v2690_v35  ;;  %2189 = vmatprep.mubr.bf16.mxu1 %v2402_v37 }
  0x26   :  { %2195 = vmatprep.subr.bf16.mxu1 %v3568_v34 }
  0x27   :  { %569 = vmatpush1.bf16.msra.mxu0 %v2662_v29 }
  0x28   :  { %570 = vmatprep.subr.bf16.mxu0 %v2669_v30 }
  0x29   :  { %2196 = vmatpush3.bf16.msra.mxu1 %v2712_v39 }
  0x2a   :  { %278 = vmatmul.mubr.bf16.gmra.mrb[4].mxu0 %v2393_v31  ;;  %2197 = vmatprep.subr.bf16.mxu1 %v3568_v34 }
  0x2b   :  { %571 = vmatpush1.bf16.msra.mxu0 %v2678_v32  ;;  %287 = vmatprep.mubr.bf16.mxu0 %v3566_v1 }
  0x2c   :  { %572 = vmatprep.subr.bf16.mxu0 %v2684_v33  ;;  %2190 = vmatmul.mubr.bf16.gmra.mrb[4].mxu1 %v2411_v43 }
  0x2d   :  { %2198 = vmatpush3.bf16.msra.mxu1 %v2731_v42  ;;  %2209 = vmatprep.mubr.msk.bf16.mxu1 %vm2533_vm0, %v3568_v34 }
  0x2e   :  { %2199 = vmatprep.subr.bf16.mxu1 %v3568_v34 }
  0x2f   :  { %573 = vmatpush1.bf16.msra.mxu0 %v2696_v36 }
  0x30   :  { %574 = vmatprep.subr.bf16.mxu0 %v2706_v38 }
  0x31   :  { %2200 = vmatpush3.bf16.msra.mxu1 %v2754_v46 }
  0x32   :  { %288 = vmatmul.mubr.bf16.gmra.mrb[8].mxu0 %v2402_v37  ;;  %2201 = vmatprep.subr.bf16.mxu1 %v3568_v34 }
  0x33   :  { %575 = vmatpush1.bf16.msra.mxu0 %v2719_v40  ;;  %297 = vmatprep.mubr.bf16.mxu0 %v3566_v1 }
  0x34   :  { %576 = vmatprep.subr.bf16.mxu0 %v2725_v41 }
  0x35   :  { %2202 = vmatpush3.bf16.msra.mxu1 %v2775_v49 }
  0x36   :  { %2203 = vmatprep.subr.bf16.mxu1 %v3568_v34 }
  0x37   :  { %577 = vmatpush1.bf16.msra.mxu0 %v2741_v44 }
  0x38   :  { %578 = vmatprep.subr.bf16.mxu0 %v2748_v45 }
  0x39   :  { %2204 = vmatpush3.bf16.msra.mxu1 %v2790_v51 }
  0x3a   :  { %298 = vmatmul.mubr.bf16.gmra.mrb[12].mxu0 %v2411_v43  ;;  %2205 = vmatprep.subr.bf16.mxu1 %v3568_v34 }
  0x3b   :  { %579 = vmatpush1.bf16.msra.mxu0 %v2763_v47  ;;  %598 = vmatprep.mubr.bf16.mxu0 %v3566_v1 }
  0x3c   :  { %580 = vmatprep.subr.bf16.mxu0 %v2769_v48 }
  0x3d   :  { %2206 = vmatpush3.bf16.msra.mxu1 %v2799_v52 }
  0x3e   :  { %2207 = vmatprep.subr.bf16.mxu1 %v3568_v34 }
  0x3f   :  { %581 = vmatpush1.bf16.msra.mxu0 %v2782_v50 }
  0x40   :  { %674 = vmatprep.subr.bf16.mxu0 %v2639_v24 }
  0x41   :  { %2208 = vmatpush3.bf16.msra.mxu1 %v2809_v54 }
  0x42   :  { %599 = vmatmul.mubr.bf16.vlgmr.msra.gmra.mrb[16].mxu0 %v2534_v53  ;;  %2213 = vmatprep.subr.bf16.mxu1 %v3568_v34 }
  0x43   :  { %675 = vmatpush1.bf16.msra.mxu0 %v2647_v26  ;;  %706 = vmatprep.mubr.bf16.mxu0 %v3566_v1 }
  0x44   :  { %676 = vmatprep.subr.bf16.mxu0 %v2653_v27  ;;  %2210 = vmatmul.mubr.bf16.vlgmr.msra.gmra.mrb[8].mxu1 %v2534_v53 }
  0x45   :  { %2214 = vmatpush3.bf16.msra.mxu1 %v2690_v35  ;;  %2229 = vmatprep.mubr.msk.bf16.mxu1 %vm2533_vm0, %v3568_v34 }
  0x46   :  { %2215 = vmatprep.subr.bf16.mxu1 %v3568_v34 }
  0x47   :  { %677 = vmatpush1.bf16.msra.mxu0 %v2662_v29 }
  0x48   :  { %678 = vmatprep.subr.bf16.mxu0 %v2669_v30 }
  0x49   :  { %2216 = vmatpush3.bf16.msra.mxu1 %v2712_v39 }
  0x4a   :  { %2217 = vmatprep.subr.bf16.mxu1 %v3568_v34 }
  0x4b   :  { %679 = vmatpush1.bf16.msra.mxu0 %v2678_v32 }
  0x4c   :  { %680 = vmatprep.subr.bf16.mxu0 %v2684_v33 }
  0x4d   :  { %2218 = vmatpush3.bf16.msra.mxu1 %v2731_v42 }
  0x4e   :  { %2219 = vmatprep.subr.bf16.mxu1 %v3568_v34 }
  0x4f   :  { %681 = vmatpush1.bf16.msra.mxu0 %v2696_v36 }
  0x50   :  { %682 = vmatprep.subr.bf16.mxu0 %v2706_v38 }
  0x51   :  { %2220 = vmatpush3.bf16.msra.mxu1 %v2754_v46 }
  0x52   :  { %2221 = vmatprep.subr.bf16.mxu1 %v3568_v34 }
  0x53   :  { %683 = vmatpush1.bf16.msra.mxu0 %v2719_v40 }
  0x54   :  { %684 = vmatprep.subr.bf16.mxu0 %v2725_v41 }
  0x55   :  { %2222 = vmatpush3.bf16.msra.mxu1 %v2775_v49 }
  0x56   :  { %2223 = vmatprep.subr.bf16.mxu1 %v3568_v34 }
  0x57   :  { %685 = vmatpush1.bf16.msra.mxu0 %v2741_v44 }
  0x58   :  { %686 = vmatprep.subr.bf16.mxu0 %v2748_v45 }
  0x59   :  { %2224 = vmatpush3.bf16.msra.mxu1 %v2790_v51 }
  0x5a   :  { %2225 = vmatprep.subr.bf16.mxu1 %v3568_v34 }
  0x5b   :  { %687 = vmatpush1.bf16.msra.mxu0 %v2763_v47 }
  0x5c   :  { %688 = vmatprep.subr.bf16.mxu0 %v2769_v48 }
  0x5d   :  { %2226 = vmatpush3.bf16.msra.mxu1 %v2799_v52 }
  0x5e   :  { %2227 = vmatprep.subr.bf16.mxu1 %v3568_v34 }
  0x5f   :  { %689 = vmatpush1.bf16.msra.mxu0 %v2782_v50 }
  0x60   :  { %784 = vmatprep.subr.bf16.mxu0 %v2639_v24 }
  0x61   :  { %2228 = vmatpush3.bf16.msra.mxu1 %v2809_v54 }
  0x62   :  { %2233 = vmatprep.subr.bf16.mxu1 %v3568_v34 }
  0xf5   :  { %v269_v60 = vpop.f32.mrb[0].mxu0 }
  0xf6   :  { %v271_v62 = vpop.f32.mrb[1].mxu0 }
  0xf7   :  { %v273_v0 = vpop.f32.mrb[2].mxu0  ;;  %v2187_v12 = vpop.f32.mrb[0].mxu1 }
  0xf8   :  { %v2853_v2 = vadd.f32 %v273_v0, %v71_v61  ;;  %v275_v3 = vpop.f32.mrb[3].mxu0  ;;  %v2867_v15 = vadd.f32 %v2187_v12, %v2858_v6  ;;  %v342_v16 = vpop.f32.mrb[1].mxu1 }
  0xf9   :  { %v2856_v5 = vadd.f32 %v275_v3, %v75_v63  ;;  %v2188_v18 = vpop.f32.mrb[2].mxu1 }
  0xfa   :  { %v2872_v19 = vadd.f32 %v2188_v18, %v2858_v6  ;;  %v345_v20 = vpop.f32.mrb[3].mxu1 }
  0xfb   :  { %v2875_v21 = vadd.f32 %v345_v20, %v2858_v6 }
  0xfd   :  { %v279_v7 = vpop.f32.mrb[4].mxu0 }
  0xfe   :  { %v2860_v8 = vadd.f32 %v279_v7, %v71_v61  ;;  %v281_v9 = vpop.f32.mrb[5].mxu0 }
  0xff   :  { %v2862_v10 = vadd.f32 %v281_v9, %v75_v63  ;;  %v283_v11 = vpop.f32.mrb[6].mxu0  ;;  %v2191_v37 = vpop.f32.mrb[4].mxu1 }
 0x100   :  { %v2864_v13 = vadd.f32 %v283_v11, %v71_v61  ;;  %v285_v14 = vpop.f32.mrb[7].mxu0  ;;  %v2884_v55 = vadd.f32 %v2191_v37, %v2858_v6  ;;  %v358_v57 = vpop.f32.mrb[5].mxu1  ;;  %v272_v37 = vadd.f32 %v271_v62, %v75_v63 }
 0x101   :  { %v2869_v17 = vadd.f32 %v285_v14, %v75_v63  ;;  %v2889_v59 = vadd.f32 %v358_v57, %v2858_v6  ;;  %v2192_v0 = vpop.f32.mrb[6].mxu1 }
 0x102   :  { %3570 = vst [vmem:[#allocation5_spill] sm:$0xff] %v2884_v55  ;;  %v2892_v3 = vadd.f32 %v2192_v0, %v2858_v6  ;;  %v361_v4 = vpop.f32.mrb[7].mxu1 }
 0x103   :  { %v2895_v7 = vadd.f32 %v361_v4, %v2858_v6 }
 0x104   :  { %3571 = vst [vmem:[#allocation6_spill] sm:$0xff] %v2892_v3 }
 0x105   :  { %v289_v22 = vpop.f32.mrb[8].mxu0 }
 0x106   :  { %v2877_v23 = vadd.f32 %v289_v22, %v71_v61  ;;  %v291_v25 = vpop.f32.mrb[9].mxu0 }
 0x107   :  { %v2879_v28 = vadd.f32 %v291_v25, %v75_v63  ;;  %v293_v31 = vpop.f32.mrb[10].mxu0 }
 0x108   :  { %v2881_v43 = vadd.f32 %v293_v31, %v71_v61  ;;  %v295_v53 = vpop.f32.mrb[11].mxu0  ;;  %v270_v31 = vadd.f32 %v269_v60, %v71_v61  ;;  %v2908_v60 = vld [vmem:[%s3564_s4] ss:$0 sm:$0xff] }
 0x109   :  { %v2886_v58 = vadd.f32 %v295_v53, %v75_v63 }
 0x10d   :  { %v299_v9 = vpop.f32.mrb[12].mxu0 }
 0x10e   :  { %v2897_v11 = vadd.f32 %v299_v9, %v71_v61  ;;  %v301_v12 = vpop.f32.mrb[13].mxu0 }
 0x10f   :  { %v2899_v14 = vadd.f32 %v301_v12, %v75_v63  ;;  %v303_v18 = vpop.f32.mrb[14].mxu0 }
 0x110   :  { %3572 = vst [vmem:[#allocation7_spill] sm:$0xff] %v2897_v11  ;;  %v2901_v20 = vadd.f32 %v303_v18, %v71_v61  ;;  %v305_v22 = vpop.f32.mrb[15].mxu0 }
 0x111   :  { %3573 = vst [vmem:[#allocation8_spill] sm:$0xff] %v2899_v14  ;;  %v2903_v25 = vadd.f32 %v305_v22, %v75_v63 }
 0x112   :  { %3574 = vst [vmem:[#allocation9_spill] sm:$0xff] %v2901_v20 }
 0x115   :  { %v600_v53 = vpop.f32.mrb[16].mxu0 }
 0x116   :  { %v650_v57 = vadd.f32 %v600_v53, %v270_v31  ;;  %v602_v0 = vpop.f32.mrb[17].mxu0 }
 0x117   :  { %v657_v1 = vadd.f32 %v602_v0, %v272_v37  ;;  %v604_v4 = vpop.f32.mrb[18].mxu0  ;;  %v641_v55 = vpop.f32.mrb[8].mxu1 }
 0x118   :  { %v2037_v34 = vmul.f32 -1.442695, %v650_v57  ;;  %v605_v3 = vpop.f32.mrb[19].mxu0  ;;  %v2211_v12 = vpop.f32.mrb[9].mxu1  ;;  %v664_v62 = vadd.f32 %v2908_v60, %v641_v55 }
 0x119   :  { %v2038_v9 = vmul.f32 -1.442695, %v657_v1  ;;  %v644_v14 = vpop.f32.mrb[10].mxu1  ;;  %v343_v1 = vadd.f32 %v342_v16, %v2858_v6 }
 0x11a   :  { %2426 = vpow2.f32 %v2037_v34  ;;  %v2212_v18 = vpop.f32.mrb[11].mxu1  ;;  %v2535_v14 = vmov 1966171168  }
 0x11b   :  { %2428 = vpow2.f32 %v2038_v9  ;;  %v1448_v31 = vunpack.c.l.s4 %v2535_v14 }
 0x124   :  { %v2427_v20 = vpop.eup %2426 }
 0x125   :  { %v654_v11 = vadd.f32 1.0, %v2427_v20  ;;  %v2429_v22 = vpop.eup %2428 }
 0x126   :  { %v661_v61 = vadd.f32 1.0, %v2429_v22 }
 0x127   :  { %2430 = vrcp.f32 %v654_v11  ;;  %v1449_v11 = vunpack.c.0.s8 %v1448_v31 }
 0x128   :  { %2432 = vrcp.f32 %v661_v61 }
 0x129   :  { %v2913_v4 = vsub.s32 %v1449_v11, %v2846_v56 }
 0x131   :  { %v2431_v63 = vpop.eup %2430 }
 0x132   :  { %v665_v34 = vmul.f32 %v2431_v63, %v664_v62  ;;  %v2433_v20 = vpop.eup %2432 }
 0x133   :  { %v668_v37 = vsub.f32 1.0, %v2433_v20  ;;  %v670_v57 = vmul.f32 0.0, %v2433_v20 }
 0x134   :  { %v666_v3 = vadd.f32 %v665_v34, %v343_v1  ;;  %v3575_v1 = vmov 0.0   ;;  %v3576_v34 = vmov 0  }
 0x136   :  { %2434 = vtanh.f32 %v666_v3 }
 0x140   :  { %v2435_v53 = vpop.eup %2434 }
 0x141   :  { %v669_v0 = vmul.f32 %v2435_v53, %v668_v37 }
 0x143   :  { %v2915_v9 = vadd.f32 %v670_v57, %v669_v0 }
 0x145   :  { %v673_v6 = vpack.c.bf16 %v2915_v9, %v2915_v9  ;;  %v1446_v16 = vcombine.high %v2915_v9, %v2915_v9  ;;  %v1453_v55 = vrot.slane %v2915_v9, %v2913_v4 }
 0x147   :  { %707 = vmatmul.mubr.bf16.vlgmr.msra.gmra.mrb[20].mxu0 %v673_v6  ;;  %v1460_v12 = vrot.slane %v1446_v16, %v2913_v4  ;;  %v1461_v18 = vcombine.high %v1453_v55, %v1453_v55  ;;  %v1469_v22 = vrot.slane %v1453_v55, %v2913_v4  ;;  %2053 = vst.sshfl [vmem:[%s3565_s5] sm:$0x1 pattern:$0x73625140] %v1453_v55 }
 0x148   :  { %2230 = vmatmul.mubr.bf16.vlgmr.msra.gmra.mrb[12].mxu1 %v673_v6  ;;  %785 = vmatpush1.bf16.msra.mxu0 %v2647_v26 }
 0x149   :  { %2234 = vmatpush3.bf16.msra.mxu1 %v2690_v35  ;;  %v1462_v56 = vcombine.high %v1460_v12, %v1460_v12  ;;  %v1476_v61 = vrot.slane %v1460_v12, %v2913_v4  ;;  %v1483_v62 = vrot.slane %v1461_v18, %v2913_v4  ;;  %v1491_v63 = vcombine.high %v1469_v22, %v1469_v22 }
 0x14a   :  { %2054 = vst.sshfl [vmem:[%s3565_s5 + $0x8] sm:$0x1 pattern:$0x73625140] %v1461_v18  ;;  %786 = vmatprep.subr.bf16.mxu0 %v2653_v27  ;;  %2235 = vmatprep.subr.bf16.mxu1 %v3575_v1 }
 0x14b   :  { %2055 = vst.sshfl [vmem:[%s3565_s5 + $0x20] sm:$0x1 pattern:$0x73625140] %v1460_v12  ;;  %816 = vmatprep.mubr.bf16.mxu0 %v3576_v34  ;;  %v1490_v3 = vrot.slane %v1462_v56, %v2913_v4  ;;  %v1492_v14 = vcombine.high %v1476_v61, %v1476_v61  ;;  %v1493_v31 = vcombine.high %v1483_v62, %v1483_v62  ;;  %1505 = vst [vmem:[%s3565_s5 + $0x10] sm:$0x1] %v1491_v63 }
 0x14c   :  { %2056 = vst.sshfl [vmem:[%s3565_s5 + $0x28] sm:$0x1 pattern:$0x73625140] %v1462_v56  ;;  %2249 = vmatprep.mubr.msk.bf16.mxu1 %vm2533_vm0, %v3575_v1  ;;  %787 = vmatpush1.bf16.msra.mxu0 %v2662_v29 }
 0x14d   :  { %2236 = vmatpush3.bf16.msra.mxu1 %v2712_v39  ;;  %v1494_v20 = vcombine.high %v1490_v3, %v1490_v3  ;;  %1506 = vst [vmem:[%s3565_s5 + $0x18] sm:$0x1] %v1493_v31  ;;  %1509 = vst [vmem:[%s3565_s5 + $0x30] sm:$0x1] %v1492_v14  ;;  %788 = vmatprep.subr.bf16.mxu0 %v2669_v30 }
 0x14e   :  { %2237 = vmatprep.subr.bf16.mxu1 %v3575_v1 }
 0x14f   :  { %1510 = vst [vmem:[%s3565_s5 + $0x38] sm:$0x1] %v1494_v20 }
 0x150   :  { %789 = vmatpush1.bf16.msra.mxu0 %v2678_v32 }
 0x151   :  { %2238 = vmatpush3.bf16.msra.mxu1 %v2731_v42  ;;  %790 = vmatprep.subr.bf16.mxu0 %v2684_v33 }
 0x152   :  { %2239 = vmatprep.subr.bf16.mxu1 %v3575_v1 }
 0x154   :  { %791 = vmatpush1.bf16.msra.mxu0 %v2696_v36 }
 0x155   :  { %2240 = vmatpush3.bf16.msra.mxu1 %v2754_v46  ;;  %792 = vmatprep.subr.bf16.mxu0 %v2706_v38 }
 0x156   :  { %2241 = vmatprep.subr.bf16.mxu1 %v3575_v1 }
 0x158   :  { %793 = vmatpush1.bf16.msra.mxu0 %v2719_v40 }
 0x159   :  { %2242 = vmatpush3.bf16.msra.mxu1 %v2775_v49  ;;  %794 = vmatprep.subr.bf16.mxu0 %v2725_v41 }
 0x15a   :  { %2243 = vmatprep.subr.bf16.mxu1 %v3575_v1 }
 0x15c   :  { %795 = vmatpush1.bf16.msra.mxu0 %v2741_v44 }
 0x15d   :  { %2244 = vmatpush3.bf16.msra.mxu1 %v2790_v51  ;;  %796 = vmatprep.subr.bf16.mxu0 %v2748_v45 }
 0x15e   :  { %2245 = vmatprep.subr.bf16.mxu1 %v3575_v1 }
 0x160   :  { %797 = vmatpush1.bf16.msra.mxu0 %v2763_v47 }
 0x161   :  { %2246 = vmatpush3.bf16.msra.mxu1 %v2799_v52  ;;  %798 = vmatprep.subr.bf16.mxu0 %v2769_v48 }
 0x162   :  { %2247 = vmatprep.subr.bf16.mxu1 %v3575_v1 }
 0x164   :  { %799 = vmatpush1.bf16.msra.mxu0 %v2782_v50 }
 0x165   :  { %2248 = vmatpush3.bf16.msra.mxu1 %v2809_v54  ;;  %894 = vmatprep.subr.bf16.mxu0 %v2639_v24 }
 0x166   :  { %2253 = vmatprep.subr.bf16.mxu1 %v3575_v1 }
 0x21a   :  { %v708_v11 = vpop.f32.mrb[20].mxu0 }
 0x21b   :  { %v749_v37 = vpop.f32.mrb[12].mxu1  ;;  %v759_v53 = vadd.f32 %v708_v11, %v2853_v2  ;;  %v710_v57 = vpop.f32.mrb[21].mxu0 }
 0x21c   :  { %v2231_v0 = vpop.f32.mrb[13].mxu1  ;;  %v766_v6 = vadd.f32 %v710_v57, %v2856_v5  ;;  %v712_v16 = vpop.f32.mrb[22].mxu0  ;;  %v773_v14 = vadd.f32 %v2908_v60, %v749_v37 }
 0x21d   :  { %v752_v55 = vpop.f32.mrb[14].mxu1  ;;  %v2039_v12 = vmul.f32 -1.442695, %v759_v53  ;;  %v713_v18 = vpop.f32.mrb[23].mxu0 }
 0x21e   :  { %v2232_v22 = vpop.f32.mrb[15].mxu1  ;;  %v2040_v56 = vmul.f32 -1.442695, %v766_v6 }
 0x21f   :  { %2436 = vpow2.f32 %v2039_v12 }
 0x220   :  { %2438 = vpow2.f32 %v2040_v56 }
 0x229   :  { %v2437_v61 = vpop.eup %2436 }
 0x22a   :  { %v763_v62 = vadd.f32 1.0, %v2437_v61  ;;  %v2439_v63 = vpop.eup %2438 }
 0x22b   :  { %v770_v3 = vadd.f32 1.0, %v2439_v63 }
 0x22c   :  { %2440 = vrcp.f32 %v763_v62 }
 0x22d   :  { %2442 = vrcp.f32 %v770_v3 }
 0x236   :  { %v2441_v2 = vpop.eup %2440 }
 0x237   :  { %v774_v31 = vmul.f32 %v2441_v2, %v773_v14  ;;  %v2443_v20 = vpop.eup %2442 }
 0x238   :  { %v777_v11 = vsub.f32 1.0, %v2443_v20  ;;  %v779_v57 = vmul.f32 %v2443_v20, %v2915_v9 }
 0x239   :  { %v775_v5 = vadd.f32 %v774_v31, %v2875_v21 }
 0x23b   :  { %2444 = vtanh.f32 %v775_v5 }
 0x245   :  { %v2445_v53 = vpop.eup %2444 }
 0x246   :  { %v778_v0 = vmul.f32 %v2445_v53, %v777_v11 }
 0x248   :  { %v2992_v6 = vadd.f32 %v779_v57, %v778_v0 }
 0x24a   :  { %v783_v16 = vpack.c.bf16 %v2992_v6, %v2992_v6  ;;  %v1513_v37 = vcombine.high %v2992_v6, %v2992_v6  ;;  %v1520_v55 = vrot.slane %v2992_v6, %v2913_v4 }
 0x24c   :  { %817 = vmatmul.mubr.bf16.vlgmr.msra.gmra.mrb[24].mxu0 %v783_v16  ;;  %v1527_v21 = vrot.slane %v1513_v37, %v2913_v4  ;;  %v1528_v12 = vcombine.high %v1520_v55, %v1520_v55  ;;  %v1536_v18 = vrot.slane %v1520_v55, %v2913_v4  ;;  %2057 = vst.sshfl [vmem:[%s3565_s5 + $0x1] sm:$0x1 pattern:$0x73625140] %v1520_v55 }
 0x24d   :  { %2250 = vmatmul.mubr.bf16.vlgmr.msra.gmra.mrb[16].mxu1 %v783_v16  ;;  %895 = vmatpush1.bf16.msra.mxu0 %v2647_v26 }
 0x24e   :  { %2254 = vmatpush3.bf16.msra.mxu1 %v2690_v35  ;;  %v1529_v9 = vcombine.high %v1527_v21, %v1527_v21  ;;  %v1543_v22 = vrot.slane %v1527_v21, %v2913_v4  ;;  %v1550_v56 = vrot.slane %v1528_v12, %v2913_v4  ;;  %v1558_v61 = vcombine.high %v1536_v18, %v1536_v18 }
 0x24f   :  { %2058 = vst.sshfl [vmem:[%s3565_s5 + $0x9] sm:$0x1 pattern:$0x73625140] %v1528_v12  ;;  %896 = vmatprep.subr.bf16.mxu0 %v2653_v27  ;;  %2255 = vmatprep.subr.bf16.mxu1 %v3575_v1 }
 0x250   :  { %2059 = vst.sshfl [vmem:[%s3565_s5 + $0x21] sm:$0x1 pattern:$0x73625140] %v1527_v21  ;;  %926 = vmatprep.mubr.bf16.mxu0 %v3576_v34  ;;  %v1557_v62 = vrot.slane %v1529_v9, %v2913_v4  ;;  %v1559_v63 = vcombine.high %v1543_v22, %v1543_v22  ;;  %v1560_v3 = vcombine.high %v1550_v56, %v1550_v56  ;;  %1572 = vst [vmem:[%s3565_s5 + $0x11] sm:$0x1] %v1558_v61 }
 0x251   :  { %2060 = vst.sshfl [vmem:[%s3565_s5 + $0x29] sm:$0x1 pattern:$0x73625140] %v1529_v9  ;;  %2269 = vmatprep.mubr.msk.bf16.mxu1 %vm2533_vm0, %v3575_v1  ;;  %897 = vmatpush1.bf16.msra.mxu0 %v2662_v29 }
 0x252   :  { %2256 = vmatpush3.bf16.msra.mxu1 %v2712_v39  ;;  %v1561_v14 = vcombine.high %v1557_v62, %v1557_v62  ;;  %1573 = vst [vmem:[%s3565_s5 + $0x19] sm:$0x1] %v1560_v3  ;;  %1576 = vst [vmem:[%s3565_s5 + $0x31] sm:$0x1] %v1559_v63  ;;  %898 = vmatprep.subr.bf16.mxu0 %v2669_v30 }
 0x253   :  { %2257 = vmatprep.subr.bf16.mxu1 %v3575_v1 }
 0x254   :  { %1577 = vst [vmem:[%s3565_s5 + $0x39] sm:$0x1] %v1561_v14 }
 0x255   :  { %899 = vmatpush1.bf16.msra.mxu0 %v2678_v32 }
 0x256   :  { %2258 = vmatpush3.bf16.msra.mxu1 %v2731_v42  ;;  %900 = vmatprep.subr.bf16.mxu0 %v2684_v33 }
 0x257   :  { %2259 = vmatprep.subr.bf16.mxu1 %v3575_v1 }
 0x259   :  { %901 = vmatpush1.bf16.msra.mxu0 %v2696_v36 }
 0x25a   :  { %2260 = vmatpush3.bf16.msra.mxu1 %v2754_v46  ;;  %902 = vmatprep.subr.bf16.mxu0 %v2706_v38 }
 0x25b   :  { %2261 = vmatprep.subr.bf16.mxu1 %v3575_v1 }
 0x25d   :  { %903 = vmatpush1.bf16.msra.mxu0 %v2719_v40 }
 0x25e   :  { %2262 = vmatpush3.bf16.msra.mxu1 %v2775_v49  ;;  %904 = vmatprep.subr.bf16.mxu0 %v2725_v41 }
 0x25f   :  { %2263 = vmatprep.subr.bf16.mxu1 %v3575_v1 }
 0x261   :  { %905 = vmatpush1.bf16.msra.mxu0 %v2741_v44 }
 0x262   :  { %2264 = vmatpush3.bf16.msra.mxu1 %v2790_v51  ;;  %906 = vmatprep.subr.bf16.mxu0 %v2748_v45 }
 0x263   :  { %2265 = vmatprep.subr.bf16.mxu1 %v3575_v1 }
 0x265   :  { %907 = vmatpush1.bf16.msra.mxu0 %v2763_v47 }
 0x266   :  { %2266 = vmatpush3.bf16.msra.mxu1 %v2799_v52  ;;  %908 = vmatprep.subr.bf16.mxu0 %v2769_v48 }
 0x267   :  { %2267 = vmatprep.subr.bf16.mxu1 %v3575_v1 }
 0x269   :  { %909 = vmatpush1.bf16.msra.mxu0 %v2782_v50 }
 0x26a   :  { %2268 = vmatpush3.bf16.msra.mxu1 %v2809_v54  ;;  %1004 = vmatprep.subr.bf16.mxu0 %v2639_v24 }
 0x26b   :  { %2273 = vmatprep.subr.bf16.mxu1 %v3575_v1 }
 0x31f   :  { %v818_v2 = vpop.f32.mrb[24].mxu0 }
 0x320   :  { %v859_v31 = vpop.f32.mrb[16].mxu1  ;;  %v869_v5 = vadd.f32 %v818_v2, %v2860_v8  ;;  %v820_v20 = vpop.f32.mrb[25].mxu0 }
 0x321   :  { %v2251_v11 = vpop.f32.mrb[17].mxu1  ;;  %v876_v53 = vadd.f32 %v820_v20, %v2862_v10  ;;  %v822_v57 = vpop.f32.mrb[26].mxu0  ;;  %v883_v56 = vadd.f32 %v2908_v60, %v859_v31 }
 0x322   :  { %v862_v0 = vpop.f32.mrb[18].mxu1  ;;  %v2041_v16 = vmul.f32 -1.442695, %v869_v5  ;;  %v823_v37 = vpop.f32.mrb[27].mxu0 }
 0x323   :  { %v2252_v55 = vpop.f32.mrb[19].mxu1  ;;  %v2042_v21 = vmul.f32 -1.442695, %v876_v53 }
 0x324   :  { %2446 = vpow2.f32 %v2041_v16 }
 0x325   :  { %2448 = vpow2.f32 %v2042_v21 }
 0x32e   :  { %v2447_v12 = vpop.eup %2446 }
 0x32f   :  { %v873_v18 = vadd.f32 1.0, %v2447_v12  ;;  %v2449_v9 = vpop.eup %2448 }
 0x330   :  { %v880_v22 = vadd.f32 1.0, %v2449_v9 }
 0x331   :  { %2450 = vrcp.f32 %v873_v18 }
 0x332   :  { %2452 = vrcp.f32 %v880_v22 }
 0x33b   :  { %v2451_v8 = vpop.eup %2450 }
 0x33c   :  { %v884_v61 = vmul.f32 %v2451_v8, %v883_v56  ;;  %v2453_v62 = vpop.eup %2452 }
 0x33d   :  { %v887_v63 = vsub.f32 1.0, %v2453_v62  ;;  %v889_v14 = vmul.f32 %v2453_v62, %v2992_v6 }
 0x33e   :  { %v885_v10 = vadd.f32 %v884_v61, %v2867_v15 }
 0x340   :  { %2454 = vtanh.f32 %v885_v10 }
 0x34a   :  { %v2455_v3 = vpop.eup %2454 }
 0x34b   :  { %v888_v2 = vmul.f32 %v2455_v3, %v887_v63 }
 0x34d   :  { %v3069_v5 = vadd.f32 %v889_v14, %v888_v2 }
 0x34f   :  { %v893_v20 = vpack.c.bf16 %v3069_v5, %v3069_v5  ;;  %v1580_v31 = vcombine.high %v3069_v5, %v3069_v5  ;;  %v1587_v11 = vrot.slane %v3069_v5, %v2913_v4 }
 0x351   :  { %927 = vmatmul.mubr.bf16.vlgmr.msra.gmra.mrb[28].mxu0 %v893_v20  ;;  %v1594_v15 = vrot.slane %v1580_v31, %v2913_v4  ;;  %v1595_v53 = vcombine.high %v1587_v11, %v1587_v11  ;;  %v1603_v57 = vrot.slane %v1587_v11, %v2913_v4  ;;  %2061 = vst.sshfl [vmem:[%s3565_s5 + $0x2] sm:$0x1 pattern:$0x73625140] %v1587_v11 }
 0x352   :  { %2270 = vmatmul.mubr.bf16.vlgmr.msra.gmra.mrb[20].mxu1 %v893_v20  ;;  %1005 = vmatpush1.bf16.msra.mxu0 %v2647_v26 }
 0x353   :  { %2274 = vmatpush3.bf16.msra.mxu1 %v2690_v35  ;;  %v1596_v6 = vcombine.high %v1594_v15, %v1594_v15  ;;  %v1610_v0 = vrot.slane %v1594_v15, %v2913_v4  ;;  %v1617_v16 = vrot.slane %v1595_v53, %v2913_v4  ;;  %v1625_v37 = vcombine.high %v1603_v57, %v1603_v57 }
 0x354   :  { %2062 = vst.sshfl [vmem:[%s3565_s5 + $0xa] sm:$0x1 pattern:$0x73625140] %v1595_v53  ;;  %1006 = vmatprep.subr.bf16.mxu0 %v2653_v27  ;;  %2275 = vmatprep.subr.bf16.mxu1 %v3575_v1 }
 0x355   :  { %2063 = vst.sshfl [vmem:[%s3565_s5 + $0x22] sm:$0x1 pattern:$0x73625140] %v1594_v15  ;;  %1036 = vmatprep.mubr.bf16.mxu0 %v3576_v34  ;;  %v1624_v55 = vrot.slane %v1596_v6, %v2913_v4  ;;  %v1626_v21 = vcombine.high %v1610_v0, %v1610_v0  ;;  %v1627_v12 = vcombine.high %v1617_v16, %v1617_v16  ;;  %1639 = vst [vmem:[%s3565_s5 + $0x12] sm:$0x1] %v1625_v37 }
 0x356   :  { %2064 = vst.sshfl [vmem:[%s3565_s5 + $0x2a] sm:$0x1 pattern:$0x73625140] %v1596_v6  ;;  %2289 = vmatprep.mubr.msk.bf16.mxu1 %vm2533_vm0, %v3575_v1  ;;  %1007 = vmatpush1.bf16.msra.mxu0 %v2662_v29 }
 0x357   :  { %2276 = vmatpush3.bf16.msra.mxu1 %v2712_v39  ;;  %v1628_v27 = vcombine.high %v1624_v55, %v1624_v55  ;;  %1640 = vst [vmem:[%s3565_s5 + $0x1a] sm:$0x1] %v1627_v12  ;;  %1643 = vst [vmem:[%s3565_s5 + $0x32] sm:$0x1] %v1626_v21  ;;  %1008 = vmatprep.subr.bf16.mxu0 %v2669_v30 }
 0x358   :  { %2277 = vmatprep.subr.bf16.mxu1 %v3575_v1 }
 0x359   :  { %1644 = vst [vmem:[%s3565_s5 + $0x3a] sm:$0x1] %v1628_v27 }
 0x35a   :  { %1009 = vmatpush1.bf16.msra.mxu0 %v2678_v32 }
 0x35b   :  { %2278 = vmatpush3.bf16.msra.mxu1 %v2731_v42  ;;  %1010 = vmatprep.subr.bf16.mxu0 %v2684_v33 }
 0x35c   :  { %2279 = vmatprep.subr.bf16.mxu1 %v3575_v1 }
 0x35e   :  { %1011 = vmatpush1.bf16.msra.mxu0 %v2696_v36 }
 0x35f   :  { %2280 = vmatpush3.bf16.msra.mxu1 %v2754_v46  ;;  %1012 = vmatprep.subr.bf16.mxu0 %v2706_v38 }
 0x360   :  { %2281 = vmatprep.subr.bf16.mxu1 %v3575_v1 }
 0x362   :  { %1013 = vmatpush1.bf16.msra.mxu0 %v2719_v40 }
 0x363   :  { %2282 = vmatpush3.bf16.msra.mxu1 %v2775_v49  ;;  %1014 = vmatprep.subr.bf16.mxu0 %v2725_v41 }
 0x364   :  { %2283 = vmatprep.subr.bf16.mxu1 %v3575_v1 }
 0x366   :  { %1015 = vmatpush1.bf16.msra.mxu0 %v2741_v44 }
 0x367   :  { %2284 = vmatpush3.bf16.msra.mxu1 %v2790_v51  ;;  %1016 = vmatprep.subr.bf16.mxu0 %v2748_v45 }
 0x368   :  { %2285 = vmatprep.subr.bf16.mxu1 %v3575_v1 }
 0x36a   :  { %1017 = vmatpush1.bf16.msra.mxu0 %v2763_v47 }
 0x36b   :  { %2286 = vmatpush3.bf16.msra.mxu1 %v2799_v52  ;;  %1018 = vmatprep.subr.bf16.mxu0 %v2769_v48 }
 0x36c   :  { %2287 = vmatprep.subr.bf16.mxu1 %v3575_v1 }
 0x36e   :  { %1019 = vmatpush1.bf16.msra.mxu0 %v2782_v50 }
 0x36f   :  { %2288 = vmatpush3.bf16.msra.mxu1 %v2809_v54  ;;  %1114 = vmatprep.subr.bf16.mxu0 %v2639_v24 }
 0x370   :  { %2293 = vmatprep.subr.bf16.mxu1 %v3575_v1 }
 0x424   :  { %v928_v18 = vpop.f32.mrb[28].mxu0 }
 0x425   :  { %v969_v9 = vpop.f32.mrb[20].mxu1  ;;  %v979_v22 = vadd.f32 %v928_v18, %v2864_v13  ;;  %v930_v56 = vpop.f32.mrb[29].mxu0 }
 0x426   :  { %v2271_v8 = vpop.f32.mrb[21].mxu1  ;;  %v986_v61 = vadd.f32 %v930_v56, %v2869_v17  ;;  %v932_v10 = vpop.f32.mrb[30].mxu0  ;;  %v993_v15 = vadd.f32 %v2908_v60, %v969_v9 }
 0x427   :  { %v972_v62 = vpop.f32.mrb[22].mxu1  ;;  %v2043_v63 = vmul.f32 -1.442695, %v979_v22  ;;  %v933_v3 = vpop.f32.mrb[31].mxu0 }
 0x428   :  { %v2272_v14 = vpop.f32.mrb[23].mxu1  ;;  %v2044_v2 = vmul.f32 -1.442695, %v986_v61 }
 0x429   :  { %2456 = vpow2.f32 %v2043_v63 }
 0x42a   :  { %2458 = vpow2.f32 %v2044_v2 }
 0x433   :  { %v2457_v20 = vpop.eup %2456 }
 0x434   :  { %v983_v24 = vadd.f32 1.0, %v2457_v20  ;;  %v2459_v31 = vpop.eup %2458 }
 0x435   :  { %v990_v11 = vadd.f32 1.0, %v2459_v31 }
 0x436   :  { %2460 = vrcp.f32 %v983_v24 }
 0x437   :  { %2462 = vrcp.f32 %v990_v11 }
 0x440   :  { %v2461_v13 = vpop.eup %2460 }
 0x441   :  { %v994_v53 = vmul.f32 %v2461_v13, %v993_v15  ;;  %v2463_v57 = vpop.eup %2462 }
 0x442   :  { %v997_v6 = vsub.f32 1.0, %v2463_v57  ;;  %v999_v16 = vmul.f32 %v2463_v57, %v3069_v5 }
 0x443   :  { %v995_v17 = vadd.f32 %v994_v53, %v2872_v19  ;;  %v3249_v53 = vld [vmem:[%s3562_s2] ss:$12 sps:$4 sm:$0xff]  }
 0x445   :  { %2464 = vtanh.f32 %v995_v17  ;;  %v3255_v17 = vld [vmem:[%s3562_s2 + $0x8] ss:$12 sps:$4 sm:$0xff]  }
 0x44f   :  { %v2465_v0 = vpop.eup %2464 }
 0x450   :  { %v998_v37 = vmul.f32 %v2465_v0, %v997_v6 }
 0x452   :  { %v3146_v55 = vadd.f32 %v999_v16, %v998_v37 }
 0x454   :  { %v1003_v21 = vpack.c.bf16 %v3146_v55, %v3146_v55  ;;  %v1647_v12 = vcombine.high %v3146_v55, %v3146_v55  ;;  %v1654_v27 = vrot.slane %v3146_v55, %v2913_v4 }
 0x456   :  { %1037 = vmatmul.mubr.bf16.vlgmr.msra.gmra.mrb[32].mxu0 %v1003_v21  ;;  %v1661_v19 = vrot.slane %v1647_v12, %v2913_v4  ;;  %v1662_v18 = vcombine.high %v1654_v27, %v1654_v27  ;;  %v1670_v9 = vrot.slane %v1654_v27, %v2913_v4  ;;  %2065 = vst.sshfl [vmem:[%s3565_s5 + $0x3] sm:$0x1 pattern:$0x73625140] %v1654_v27  ;;  %v3281_v12 = vld [vmem:[%s3562_s2 + $0x18] ss:$12 sps:$4 sm:$0xff]  }
 0x457   :  { %2290 = vmatmul.mubr.bf16.vlgmr.msra.gmra.mrb[24].mxu1 %v1003_v21  ;;  %1115 = vmatpush1.bf16.msra.mxu0 %v2647_v26  ;;  %v3172_v26 = vld [vmem:[%s3562_s2 + $0x1c] ss:$12 sps:$4 sm:$0xff]   ;;  %v3287_v27 = vld [vmem:[%s3562_s2 + $0x20] ss:$12 sps:$4 sm:$0xff]  }
 0x458   :  { %2294 = vmatpush3.bf16.msra.mxu1 %v2690_v35  ;;  %v1663_v5 = vcombine.high %v1661_v19, %v1661_v19  ;;  %v1677_v22 = vrot.slane %v1661_v19, %v2913_v4  ;;  %v1684_v56 = vrot.slane %v1662_v18, %v2913_v4  ;;  %v1692_v8 = vcombine.high %v1670_v9, %v1670_v9  ;;  %v3309_v9 = vld [vmem:[%s3562_s2 + $0x30] ss:$12 sps:$4 sm:$0xff]  }
 0x459   :  { %2066 = vst.sshfl [vmem:[%s3565_s5 + $0xb] sm:$0x1 pattern:$0x73625140] %v1662_v18  ;;  %1116 = vmatprep.subr.bf16.mxu0 %v3172_v26  ;;  %2295 = vmatprep.subr.bf16.mxu1 %v3575_v1  ;;  %v3299_v18 = vld [vmem:[%s3562_s2 + $0x34] ss:$12 sps:$4 sm:$0xff]  }
 0x45a   :  { %2067 = vst.sshfl [vmem:[%s3565_s5 + $0x23] sm:$0x1 pattern:$0x73625140] %v1661_v19  ;;  %1146 = vmatprep.mubr.bf16.mxu0 %v3576_v34  ;;  %v1691_v35 = vrot.slane %v1663_v5, %v2913_v4  ;;  %v1693_v61 = vcombine.high %v1677_v22, %v1677_v22  ;;  %v1694_v10 = vcombine.high %v1684_v56, %v1684_v56  ;;  %1706 = vst [vmem:[%s3565_s5 + $0x13] sm:$0x1] %v1692_v8 }
 0x45b   :  { %2068 = vst.sshfl [vmem:[%s3565_s5 + $0x2b] sm:$0x1 pattern:$0x73625140] %v1663_v5  ;;  %2309 = vmatprep.mubr.msk.bf16.mxu1 %vm2533_vm0, %v3575_v1  ;;  %1117 = vmatpush1.bf16.msra.mxu0 %v2662_v29  ;;  %v3224_v29 = vld [vmem:[%s3562_s2 + $0x4] ss:$12 sps:$4 sm:$0xff]  }
 0x45c   :  { %2296 = vmatpush3.bf16.msra.mxu1 %v2712_v39  ;;  %v1695_v62 = vcombine.high %v1691_v35, %v1691_v35  ;;  %1707 = vst [vmem:[%s3565_s5 + $0x1b] sm:$0x1] %v1694_v10  ;;  %1710 = vst [vmem:[%s3565_s5 + $0x33] sm:$0x1] %v1693_v61  ;;  %1118 = vmatprep.subr.bf16.mxu0 %v2669_v30  ;;  %v3315_v5 = vld [vmem:[%s3562_s2 + $0x38] ss:$12 sps:$4 sm:$0xff]  }
 0x45d   :  { %2297 = vmatprep.subr.bf16.mxu1 %v3575_v1  ;;  %v3321_v22 = vld [vmem:[%s3562_s2 + $0x4c] ss:$12 sps:$4 sm:$0xff]   ;;  %v3328_v56 = vld [vmem:[%s3562_s2 + $0x48] ss:$12 sps:$4 sm:$0xff]   ;;  %v3334_v8 = vld [vmem:[%s3562_s2 + $0x50] ss:$12 sps:$4 sm:$0xff]  }
 0x45e   :  { %1711 = vst [vmem:[%s3565_s5 + $0x3b] sm:$0x1] %v1695_v62  ;;  %v3340_v35 = vld [vmem:[%s3562_s2 + $0x64] ss:$12 sps:$4 sm:$0xff]   ;;  %v3347_v61 = vld [vmem:[%s3562_s2 + $0x60] ss:$12 sps:$4 sm:$0xff]  }
 0x45f   :  { %1119 = vmatpush1.bf16.msra.mxu0 %v2678_v32  ;;  %v3353_v10 = vld [vmem:[%s3562_s2 + $0x68] ss:$12 sps:$4 sm:$0xff]  }
 0x460   :  { %2298 = vmatpush3.bf16.msra.mxu1 %v2731_v42  ;;  %1120 = vmatprep.subr.bf16.mxu0 %v2684_v33  ;;  %v3359_v62 = vld [vmem:[%s3562_s2 + $0x7c] ss:$12 sps:$4 sm:$0xff]  }
 0x461   :  { %2299 = vmatprep.subr.bf16.mxu1 %v3575_v1 }
 0x463   :  { %1121 = vmatpush1.bf16.msra.mxu0 %v2696_v36 }
 0x464   :  { %2300 = vmatpush3.bf16.msra.mxu1 %v2754_v46  ;;  %1122 = vmatprep.subr.bf16.mxu0 %v2706_v38 }
 0x465   :  { %2301 = vmatprep.subr.bf16.mxu1 %v3575_v1 }
 0x467   :  { %1123 = vmatpush1.bf16.msra.mxu0 %v2719_v40 }
 0x468   :  { %2302 = vmatpush3.bf16.msra.mxu1 %v2775_v49  ;;  %1124 = vmatprep.subr.bf16.mxu0 %v2725_v41 }
 0x469   :  { %2303 = vmatprep.subr.bf16.mxu1 %v3575_v1 }
 0x46b   :  { %1125 = vmatpush1.bf16.msra.mxu0 %v2741_v44 }
 0x46c   :  { %2304 = vmatpush3.bf16.msra.mxu1 %v2790_v51  ;;  %1126 = vmatprep.subr.bf16.mxu0 %v2748_v45 }
 0x46d   :  { %2305 = vmatprep.subr.bf16.mxu1 %v3575_v1 }
 0x46f   :  { %1127 = vmatpush1.bf16.msra.mxu0 %v2763_v47 }
 0x470   :  { %2306 = vmatpush3.bf16.msra.mxu1 %v2799_v52  ;;  %1128 = vmatprep.subr.bf16.mxu0 %v2769_v48 }
 0x471   :  { %2307 = vmatprep.subr.bf16.mxu1 %v3575_v1 }
 0x473   :  { %1129 = vmatpush1.bf16.msra.mxu0 %v2782_v50 }
 0x474   :  { %2308 = vmatpush3.bf16.msra.mxu1 %v2809_v54  ;;  %1224 = vmatprep.subr.bf16.mxu0 %v3224_v29 }
 0x475   :  { %2313 = vmatprep.subr.bf16.mxu1 %v3575_v1 }
 0x529   :  { %v1038_v30 = vpop.f32.mrb[32].mxu0 }
 0x52a   :  { %v1079_v32 = vpop.f32.mrb[24].mxu1  ;;  %v1089_v33 = vadd.f32 %v1038_v30, %v2877_v23  ;;  %v1040_v36 = vpop.f32.mrb[33].mxu0  ;;  %v3366_v30 = vld [vmem:[%s3562_s2 + $0x78] ss:$12 sps:$4 sm:$0xff]  }
 0x52b   :  { %v2291_v38 = vpop.f32.mrb[25].mxu1  ;;  %v1096_v39 = vadd.f32 %v1040_v36, %v2879_v28  ;;  %v1042_v40 = vpop.f32.mrb[34].mxu0  ;;  %v1103_v51 = vadd.f32 %v2908_v60, %v1079_v32  ;;  %v3372_v32 = vld [vmem:[%s3562_s2 + $0x80] ss:$12 sps:$4 sm:$0xff]   ;;  %v3385_v36 = vld [vmem:[%s3562_s2 + $0x90] ss:$12 sps:$4 sm:$0xff]  }
 0x52c   :  { %v1082_v41 = vpop.f32.mrb[26].mxu1  ;;  %v2045_v42 = vmul.f32 -1.442695, %v1089_v33  ;;  %v1043_v44 = vpop.f32.mrb[35].mxu0  ;;  %v3378_v33 = vld [vmem:[%s3562_s2 + $0x94] ss:$12 sps:$4 sm:$0xff]  }
 0x52d   :  { %v2292_v45 = vpop.f32.mrb[27].mxu1  ;;  %v2046_v46 = vmul.f32 -1.442695, %v1096_v39  ;;  %v3391_v38 = vld [vmem:[%s3562_s2 + $0x98] ss:$12 sps:$4 sm:$0xff]  }
 0x52e   :  { %2466 = vpow2.f32 %v2045_v42  ;;  %v3397_v39 = vld [vmem:[%s3562_s2 + $0xac] ss:$12 sps:$4 sm:$0xff]   ;;  %v3404_v40 = vld [vmem:[%s3562_s2 + $0xa8] ss:$12 sps:$4 sm:$0xff]   ;;  %v3410_v41 = vld [vmem:[%s3562_s2 + $0xb0] ss:$12 sps:$4 sm:$0xff]  }
 0x52f   :  { %2468 = vpow2.f32 %v2046_v46 }
 0x538   :  { %v2467_v47 = vpop.eup %2466 }
 0x539   :  { %v1093_v48 = vadd.f32 1.0, %v2467_v47  ;;  %v2469_v49 = vpop.eup %2468 }
 0x53a   :  { %v1100_v50 = vadd.f32 1.0, %v2469_v49 }
 0x53b   :  { %2470 = vrcp.f32 %v1093_v48 }
 0x53c   :  { %2472 = vrcp.f32 %v1100_v50 }
 0x545   :  { %v2471_v52 = vpop.eup %2470 }
 0x546   :  { %v1104_v54 = vmul.f32 %v2471_v52, %v1103_v51  ;;  %v2473_v28 = vpop.eup %2472 }
 0x547   :  { %v1107_v63 = vsub.f32 1.0, %v2473_v28  ;;  %v1109_v14 = vmul.f32 %v2473_v28, %v3146_v55 }
 0x548   :  { %v1105_v23 = vadd.f32 %v1104_v54, %v2889_v59 }
 0x54a   :  { %2474 = vtanh.f32 %v1105_v23 }
 0x554   :  { %v2475_v3 = vpop.eup %2474 }
 0x555   :  { %v1108_v2 = vmul.f32 %v2475_v3, %v1107_v63 }
 0x557   :  { %v3233_v20 = vadd.f32 %v1109_v14, %v1108_v2 }
 0x559   :  { %v1113_v24 = vpack.c.bf16 %v3233_v20, %v3233_v20  ;;  %v1714_v31 = vcombine.high %v3233_v20, %v3233_v20  ;;  %v1721_v11 = vrot.slane %v3233_v20, %v2913_v4 }
 0x55b   :  { %1147 = vmatmul.mubr.bf16.vlgmr.msra.gmra.mrb[36].mxu0 %v1113_v24  ;;  %v1728_v59 = vrot.slane %v1714_v31, %v2913_v4  ;;  %v1729_v15 = vcombine.high %v1721_v11, %v1721_v11  ;;  %v1737_v13 = vrot.slane %v1721_v11, %v2913_v4  ;;  %2069 = vst.sshfl [vmem:[%s3565_s5 + $0x4] sm:$0x1 pattern:$0x73625140] %v1721_v11 }
 0x55c   :  { %2310 = vmatmul.mubr.bf16.vlgmr.msra.gmra.mrb[28].mxu1 %v1113_v24  ;;  %1225 = vmatpush1.bf16.msra.mxu0 %v3249_v53 }
 0x55d   :  { %2314 = vmatpush3.bf16.msra.mxu1 %v3255_v17  ;;  %v1730_v57 = vcombine.high %v1728_v59, %v1728_v59  ;;  %v1744_v6 = vrot.slane %v1728_v59, %v2913_v4  ;;  %v1751_v0 = vrot.slane %v1729_v15, %v2913_v4  ;;  %v1759_v16 = vcombine.high %v1737_v13, %v1737_v13 }
 0x55e   :  { %2070 = vst.sshfl [vmem:[%s3565_s5 + $0xc] sm:$0x1 pattern:$0x73625140] %v1729_v15  ;;  %1226 = vmatprep.subr.bf16.mxu0 %v3172_v26  ;;  %2315 = vmatprep.subr.bf16.mxu1 %v3575_v1 }
 0x55f   :  { %2071 = vst.sshfl [vmem:[%s3565_s5 + $0x24] sm:$0x1 pattern:$0x73625140] %v1728_v59  ;;  %1256 = vmatprep.mubr.bf16.mxu0 %v3576_v34  ;;  %v1758_v37 = vrot.slane %v1730_v57, %v2913_v4  ;;  %v1760_v55 = vcombine.high %v1744_v6, %v1744_v6  ;;  %v1761_v21 = vcombine.high %v1751_v0, %v1751_v0  ;;  %1773 = vst [vmem:[%s3565_s5 + $0x14] sm:$0x1] %v1759_v16 }
 0x560   :  { %2072 = vst.sshfl [vmem:[%s3565_s5 + $0x2c] sm:$0x1 pattern:$0x73625140] %v1730_v57  ;;  %2329 = vmatprep.mubr.msk.bf16.mxu1 %vm2533_vm0, %v3575_v1  ;;  %1227 = vmatpush1.bf16.msra.mxu0 %v3281_v12 }
 0x561   :  { %2316 = vmatpush3.bf16.msra.mxu1 %v3287_v27  ;;  %v1762_v19 = vcombine.high %v1758_v37, %v1758_v37  ;;  %1774 = vst [vmem:[%s3565_s5 + $0x1c] sm:$0x1] %v1761_v21  ;;  %1777 = vst [vmem:[%s3565_s5 + $0x34] sm:$0x1] %v1760_v55  ;;  %1228 = vmatprep.subr.bf16.mxu0 %v3299_v18 }
 0x562   :  { %2317 = vmatprep.subr.bf16.mxu1 %v3575_v1 }
 0x563   :  { %1778 = vst [vmem:[%s3565_s5 + $0x3c] sm:$0x1] %v1762_v19 }
 0x564   :  { %1229 = vmatpush1.bf16.msra.mxu0 %v3309_v9 }
 0x565   :  { %2318 = vmatpush3.bf16.msra.mxu1 %v3315_v5  ;;  %1230 = vmatprep.subr.bf16.mxu0 %v3321_v22 }
 0x566   :  { %2319 = vmatprep.subr.bf16.mxu1 %v3575_v1 }
 0x568   :  { %1231 = vmatpush1.bf16.msra.mxu0 %v3328_v56 }
 0x569   :  { %2320 = vmatpush3.bf16.msra.mxu1 %v3334_v8  ;;  %1232 = vmatprep.subr.bf16.mxu0 %v3340_v35 }
 0x56a   :  { %2321 = vmatprep.subr.bf16.mxu1 %v3575_v1 }
 0x56c   :  { %1233 = vmatpush1.bf16.msra.mxu0 %v3347_v61 }
 0x56d   :  { %2322 = vmatpush3.bf16.msra.mxu1 %v3353_v10  ;;  %1234 = vmatprep.subr.bf16.mxu0 %v3359_v62 }
 0x56e   :  { %2323 = vmatprep.subr.bf16.mxu1 %v3575_v1 }
 0x570   :  { %1235 = vmatpush1.bf16.msra.mxu0 %v3366_v30 }
 0x571   :  { %2324 = vmatpush3.bf16.msra.mxu1 %v3372_v32  ;;  %1236 = vmatprep.subr.bf16.mxu0 %v3378_v33 }
 0x572   :  { %2325 = vmatprep.subr.bf16.mxu1 %v3575_v1 }
 0x574   :  { %1237 = vmatpush1.bf16.msra.mxu0 %v3385_v36 }
 0x575   :  { %2326 = vmatpush3.bf16.msra.mxu1 %v3391_v38  ;;  %1238 = vmatprep.subr.bf16.mxu0 %v3397_v39 }
 0x576   :  { %2327 = vmatprep.subr.bf16.mxu1 %v3575_v1 }
 0x578   :  { %1239 = vmatpush1.bf16.msra.mxu0 %v3404_v40 }
 0x579   :  { %2328 = vmatpush3.bf16.msra.mxu1 %v3410_v41  ;;  %1334 = vmatprep.subr.bf16.mxu0 %v3224_v29 }
 0x57a   :  { %2333 = vmatprep.subr.bf16.mxu1 %v3575_v1 }
 0x62e   :  { %v1148_v42 = vpop.f32.mrb[36].mxu0 }
 0x62f   :  { %v1189_v44 = vpop.f32.mrb[28].mxu1  ;;  %v1199_v45 = vadd.f32 %v1148_v42, %v2881_v43  ;;  %v1150_v46 = vpop.f32.mrb[37].mxu0  ;;  %v3579_v42 = vld [vmem:[#allocation5_spill] sm:$0xff] }
 0x630   :  { %v2311_v47 = vpop.f32.mrb[29].mxu1  ;;  %v1206_v48 = vadd.f32 %v1150_v46, %v2886_v58  ;;  %v1152_v49 = vpop.f32.mrb[38].mxu0  ;;  %v1213_v14 = vadd.f32 %v2908_v60, %v1189_v44 }
 0x631   :  { %v1192_v50 = vpop.f32.mrb[30].mxu1  ;;  %v2047_v51 = vmul.f32 -1.442695, %v1199_v45  ;;  %v1153_v52 = vpop.f32.mrb[39].mxu0 }
 0x632   :  { %v2312_v54 = vpop.f32.mrb[31].mxu1  ;;  %v2048_v23 = vmul.f32 -1.442695, %v1206_v48 }
 0x633   :  { %2476 = vpow2.f32 %v2047_v51 }
 0x634   :  { %2478 = vpow2.f32 %v2048_v23 }
 0x63d   :  { %v2477_v28 = vpop.eup %2476 }
 0x63e   :  { %v1203_v29 = vadd.f32 1.0, %v2477_v28  ;;  %v2479_v63 = vpop.eup %2478 }
 0x63f   :  { %v1210_v3 = vadd.f32 1.0, %v2479_v63 }
 0x640   :  { %2480 = vrcp.f32 %v1203_v29 }
 0x641   :  { %2482 = vrcp.f32 %v1210_v3 }
 0x64a   :  { %v2481_v43 = vpop.eup %2480 }
 0x64b   :  { %v1214_v2 = vmul.f32 %v2481_v43, %v1213_v14  ;;  %v2483_v24 = vpop.eup %2482 }
 0x64c   :  { %v1217_v31 = vsub.f32 1.0, %v2483_v24  ;;  %v1219_v59 = vmul.f32 %v2483_v24, %v3233_v20 }
 0x64d   :  { %v1215_v58 = vadd.f32 %v1214_v2, %v2895_v7 }
 0x64f   :  { %2484 = vtanh.f32 %v1215_v58 }
 0x659   :  { %v2485_v11 = vpop.eup %2484 }
 0x65a   :  { %v1218_v15 = vmul.f32 %v2485_v11, %v1217_v31 }
 0x65c   :  { %v3420_v13 = vadd.f32 %v1219_v59, %v1218_v15  ;;  %v3580_v15 = vld [vmem:[#allocation9_spill] sm:$0xff] }
 0x65e   :  { %v1223_v57 = vpack.c.bf16 %v3420_v13, %v3420_v13  ;;  %v1781_v60 = vcombine.high %v3420_v13, %v3420_v13  ;;  %v1788_v6 = vrot.slane %v3420_v13, %v2913_v4 }
 0x660   :  { %1257 = vmatmul.mubr.bf16.vlgmr.msra.gmra.mrb[40].mxu0 %v1223_v57  ;;  %v1795_v7 = vrot.slane %v1781_v60, %v2913_v4  ;;  %v1796_v0 = vcombine.high %v1788_v6, %v1788_v6  ;;  %v1804_v16 = vrot.slane %v1788_v6, %v2913_v4  ;;  %2073 = vst.sshfl [vmem:[%s3565_s5 + $0x5] sm:$0x1 pattern:$0x73625140] %v1788_v6 }
 0x661   :  { %2330 = vmatmul.mubr.bf16.vlgmr.msra.gmra.mrb[32].mxu1 %v1223_v57  ;;  %1335 = vmatpush1.bf16.msra.mxu0 %v3249_v53 }
 0x662   :  { %2334 = vmatpush3.bf16.msra.mxu1 %v3255_v17  ;;  %v1797_v20 = vcombine.high %v1795_v7, %v1795_v7  ;;  %v1811_v37 = vrot.slane %v1795_v7, %v2913_v4  ;;  %v1818_v55 = vrot.slane %v1796_v0, %v2913_v4  ;;  %v1826_v21 = vcombine.high %v1804_v16, %v1804_v16 }
 0x663   :  { %2074 = vst.sshfl [vmem:[%s3565_s5 + $0xd] sm:$0x1 pattern:$0x73625140] %v1796_v0  ;;  %1336 = vmatprep.subr.bf16.mxu0 %v3172_v26  ;;  %2335 = vmatprep.subr.bf16.mxu1 %v3575_v1 }
 0x664   :  { %2075 = vst.sshfl [vmem:[%s3565_s5 + $0x25] sm:$0x1 pattern:$0x73625140] %v1795_v7  ;;  %1366 = vmatprep.mubr.bf16.mxu0 %v3576_v34  ;;  %v1825_v53 = vrot.slane %v1797_v20, %v2913_v4  ;;  %v1827_v17 = vcombine.high %v1811_v37, %v1811_v37  ;;  %v1828_v19 = vcombine.high %v1818_v55, %v1818_v55  ;;  %1840 = vst [vmem:[%s3565_s5 + $0x15] sm:$0x1] %v1826_v21 }
 0x665   :  { %2076 = vst.sshfl [vmem:[%s3565_s5 + $0x2d] sm:$0x1 pattern:$0x73625140] %v1797_v20  ;;  %2349 = vmatprep.mubr.msk.bf16.mxu1 %vm2533_vm0, %v3575_v1  ;;  %1337 = vmatpush1.bf16.msra.mxu0 %v3281_v12 }
 0x666   :  { %2336 = vmatpush3.bf16.msra.mxu1 %v3287_v27  ;;  %v1829_v34 = vcombine.high %v1825_v53, %v1825_v53  ;;  %1841 = vst [vmem:[%s3565_s5 + $0x1d] sm:$0x1] %v1828_v19  ;;  %1844 = vst [vmem:[%s3565_s5 + $0x35] sm:$0x1] %v1827_v17  ;;  %1338 = vmatprep.subr.bf16.mxu0 %v3299_v18  ;;  %v3577_v27 = vld [vmem:[#allocation7_spill] sm:$0xff] }
 0x667   :  { %2337 = vmatprep.subr.bf16.mxu1 %v3575_v1 }
 0x668   :  { %1845 = vst [vmem:[%s3565_s5 + $0x3d] sm:$0x1] %v1829_v34 }
 0x669   :  { %1339 = vmatpush1.bf16.msra.mxu0 %v3309_v9 }
 0x66a   :  { %2338 = vmatpush3.bf16.msra.mxu1 %v3315_v5  ;;  %1340 = vmatprep.subr.bf16.mxu0 %v3321_v22  ;;  %v3578_v22 = vld [vmem:[#allocation8_spill] sm:$0xff] }
 0x66b   :  { %2339 = vmatprep.subr.bf16.mxu1 %v3575_v1 }
 0x66d   :  { %1341 = vmatpush1.bf16.msra.mxu0 %v3328_v56 }
 0x66e   :  { %2340 = vmatpush3.bf16.msra.mxu1 %v3334_v8  ;;  %1342 = vmatprep.subr.bf16.mxu0 %v3340_v35 }
 0x66f   :  { %2341 = vmatprep.subr.bf16.mxu1 %v3575_v1 }
 0x671   :  { %1343 = vmatpush1.bf16.msra.mxu0 %v3347_v61 }
 0x672   :  { %2342 = vmatpush3.bf16.msra.mxu1 %v3353_v10  ;;  %1344 = vmatprep.subr.bf16.mxu0 %v3359_v62 }
 0x673   :  { %2343 = vmatprep.subr.bf16.mxu1 %v3575_v1 }
 0x675   :  { %1345 = vmatpush1.bf16.msra.mxu0 %v3366_v30 }
 0x676   :  { %2344 = vmatpush3.bf16.msra.mxu1 %v3372_v32  ;;  %1346 = vmatprep.subr.bf16.mxu0 %v3378_v33 }
 0x677   :  { %2345 = vmatprep.subr.bf16.mxu1 %v3575_v1 }
 0x679   :  { %1347 = vmatpush1.bf16.msra.mxu0 %v3385_v36 }
 0x67a   :  { %2346 = vmatpush3.bf16.msra.mxu1 %v3391_v38  ;;  %1348 = vmatprep.subr.bf16.mxu0 %v3397_v39  ;;  %v2530_v38 = vld [vmem:[%s3564_s4] ss:$0 sm:$0xff] }
 0x67b   :  { %2347 = vmatprep.subr.bf16.mxu1 %v3575_v1 }
 0x67d   :  { %1349 = vmatpush1.bf16.msra.mxu0 %v3404_v40 }
 0x67e   :  { %2348 = vmatpush3.bf16.msra.mxu1 %v3410_v41 }
 0x733   :  { %v1258_v26 = vpop.f32.mrb[40].mxu0 }
 0x734   :  { %v1299_v12 = vpop.f32.mrb[32].mxu1  ;;  %v1309_v18 = vadd.f32 %v1258_v26, %v3577_v27  ;;  %v1260_v9 = vpop.f32.mrb[41].mxu0  ;;  %v3581_v27 = vld [vmem:[#allocation6_spill] sm:$0xff] }
 0x735   :  { %v2331_v5 = vpop.f32.mrb[33].mxu1  ;;  %v1316_v56 = vadd.f32 %v1260_v9, %v3578_v22  ;;  %v1262_v8 = vpop.f32.mrb[42].mxu0  ;;  %v1323_v39 = vadd.f32 %v2530_v38, %v1299_v12 }
 0x736   :  { %v1302_v35 = vpop.f32.mrb[34].mxu1  ;;  %v2049_v61 = vmul.f32 -1.442695, %v1309_v18  ;;  %v1263_v10 = vpop.f32.mrb[43].mxu0 }
 0x737   :  { %v2332_v62 = vpop.f32.mrb[35].mxu1  ;;  %v2050_v30 = vmul.f32 -1.442695, %v1316_v56 }
 0x738   :  { %2486 = vpow2.f32 %v2049_v61 }
 0x739   :  { %2488 = vpow2.f32 %v2050_v30 }
 0x742   :  { %v2487_v1 = vpop.eup %2486 }
 0x743   :  { %v1313_v32 = vadd.f32 1.0, %v2487_v1  ;;  %v2489_v33 = vpop.eup %2488 }
 0x744   :  { %v1320_v36 = vadd.f32 1.0, %v2489_v33 }
 0x745   :  { %2490 = vrcp.f32 %v1313_v32 }
 0x746   :  { %2492 = vrcp.f32 %v1320_v36 }
 0x74f   :  { %v2491_v40 = vpop.eup %2490 }
 0x750   :  { %v1324_v41 = vmul.f32 %v2491_v40, %v1323_v39  ;;  %v2493_v45 = vpop.eup %2492 }
 0x751   :  { %v1327_v46 = vsub.f32 1.0, %v2493_v45  ;;  %v1329_v48 = vmul.f32 %v2493_v45, %v3420_v13 }
 0x752   :  { %v1325_v44 = vadd.f32 %v1324_v41, %v3579_v42 }
 0x754   :  { %2494 = vtanh.f32 %v1325_v44 }
 0x75e   :  { %v2495_v47 = vpop.eup %2494 }
 0x75f   :  { %v1328_v49 = vmul.f32 %v2495_v47, %v1327_v46 }
 0x761   :  { %v1330_v50 = vadd.f32 %v1329_v48, %v1328_v49 }
 0x763   :  { %v1333_v51 = vpack.c.bf16 %v1330_v50, %v1330_v50  ;;  %v1848_v52 = vcombine.high %v1330_v50, %v1330_v50  ;;  %v1855_v54 = vrot.slane %v1330_v50, %v2913_v4 }
 0x765   :  { %1367 = vmatmul.mubr.bf16.vlgmr.msra.gmra.mrb[44].mxu0 %v1333_v51  ;;  %v1862_v23 = vrot.slane %v1848_v52, %v2913_v4  ;;  %v1863_v28 = vcombine.high %v1855_v54, %v1855_v54  ;;  %v1871_v29 = vrot.slane %v1855_v54, %v2913_v4  ;;  %2077 = vst.sshfl [vmem:[%s3565_s5 + $0x6] sm:$0x1 pattern:$0x73625140] %v1855_v54 }
 0x766   :  { %2350 = vmatmul.mubr.bf16.vlgmr.msra.gmra.mrb[36].mxu1 %v1333_v51 }
 0x767   :  { %v1864_v63 = vcombine.high %v1862_v23, %v1862_v23  ;;  %v1878_v3 = vrot.slane %v1862_v23, %v2913_v4  ;;  %v1885_v14 = vrot.slane %v1863_v28, %v2913_v4  ;;  %v1893_v43 = vcombine.high %v1871_v29, %v1871_v29  ;;  %2078 = vst.sshfl [vmem:[%s3565_s5 + $0xe] sm:$0x1 pattern:$0x73625140] %v1863_v28 }
 0x768   :  { %2079 = vst.sshfl [vmem:[%s3565_s5 + $0x26] sm:$0x1 pattern:$0x73625140] %v1862_v23 }
 0x769   :  { %v1892_v2 = vrot.slane %v1864_v63, %v2913_v4  ;;  %v1894_v58 = vcombine.high %v1878_v3, %v1878_v3  ;;  %v1895_v24 = vcombine.high %v1885_v14, %v1885_v14  ;;  %1907 = vst [vmem:[%s3565_s5 + $0x16] sm:$0x1] %v1893_v43  ;;  %2080 = vst.sshfl [vmem:[%s3565_s5 + $0x2e] sm:$0x1 pattern:$0x73625140] %v1864_v63 }
 0x76b   :  { %v1896_v31 = vcombine.high %v1892_v2, %v1892_v2  ;;  %1908 = vst [vmem:[%s3565_s5 + $0x1e] sm:$0x1] %v1895_v24  ;;  %1911 = vst [vmem:[%s3565_s5 + $0x36] sm:$0x1] %v1894_v58 }
 0x76d   :  { %1912 = vst [vmem:[%s3565_s5 + $0x3e] sm:$0x1] %v1896_v31 }
 0x838   :  { %v1368_v11 = vpop.f32.mrb[44].mxu0 }
 0x839   :  { %v1409_v59 = vpop.f32.mrb[36].mxu1  ;;  %v1419_v13 = vadd.f32 %v1368_v11, %v3580_v15  ;;  %v1370_v57 = vpop.f32.mrb[45].mxu0 }
 0x83a   :  { %v2351_v60 = vpop.f32.mrb[37].mxu1  ;;  %v1426_v6 = vadd.f32 %v1370_v57, %v2903_v25  ;;  %v1372_v7 = vpop.f32.mrb[46].mxu0  ;;  %v1433_v34 = vadd.f32 %v2530_v38, %v1409_v59 }
 0x83b   :  { %v1412_v0 = vpop.f32.mrb[38].mxu1  ;;  %v2051_v16 = vmul.f32 -1.442695, %v1419_v13  ;;  %v1373_v20 = vpop.f32.mrb[47].mxu0 }
 0x83c   :  { %v2352_v37 = vpop.f32.mrb[39].mxu1  ;;  %v2052_v55 = vmul.f32 -1.442695, %v1426_v6 }
 0x83d   :  { %2496 = vpow2.f32 %v2051_v16 }
 0x83e   :  { %2498 = vpow2.f32 %v2052_v55 }
 0x847   :  { %v2497_v21 = vpop.eup %2496 }
 0x848   :  { %v1423_v53 = vadd.f32 1.0, %v2497_v21  ;;  %v2499_v17 = vpop.eup %2498 }
 0x849   :  { %v1430_v19 = vadd.f32 1.0, %v2499_v17 }
 0x84a   :  { %2500 = vrcp.f32 %v1423_v53 }
 0x84b   :  { %2502 = vrcp.f32 %v1430_v19 }
 0x854   :  { %v2501_v26 = vpop.eup %2500 }
 0x855   :  { %v1434_v12 = vmul.f32 %v2501_v26, %v1433_v34  ;;  %v2503_v25 = vpop.eup %2502 }
 0x856   :  { %v1437_v9 = vsub.f32 1.0, %v2503_v25  ;;  %v1439_v56 = vmul.f32 %v2503_v25, %v1330_v50 }
 0x857   :  { %v1435_v18 = vadd.f32 %v1434_v12, %v3581_v27 }
 0x859   :  { %2504 = vtanh.f32 %v1435_v18 }
 0x863   :  { %v2505_v5 = vpop.eup %2504 }
 0x864   :  { %v1438_v22 = vmul.f32 %v2505_v5, %v1437_v9 }
 0x866   :  { %v1440_v8 = vadd.f32 %v1439_v56, %v1438_v22 }
 0x868   :  { %v1915_v35 = vcombine.high %v1440_v8, %v1440_v8  ;;  %v1922_v61 = vrot.slane %v1440_v8, %v2913_v4 }
 0x86a   :  { %v1929_v10 = vrot.slane %v1915_v35, %v2913_v4  ;;  %v1930_v62 = vcombine.high %v1922_v61, %v1922_v61  ;;  %v1938_v30 = vrot.slane %v1922_v61, %v2913_v4  ;;  %2081 = vst.sshfl [vmem:[%s3565_s5 + $0x7] sm:$0x1 pattern:$0x73625140] %v1922_v61 }
 0x86c   :  { %v1931_v1 = vcombine.high %v1929_v10, %v1929_v10  ;;  %v1945_v32 = vrot.slane %v1929_v10, %v2913_v4  ;;  %v1952_v33 = vrot.slane %v1930_v62, %v2913_v4  ;;  %v1960_v36 = vcombine.high %v1938_v30, %v1938_v30  ;;  %2082 = vst.sshfl [vmem:[%s3565_s5 + $0xf] sm:$0x1 pattern:$0x73625140] %v1930_v62 }
 0x86d   :  { %2083 = vst.sshfl [vmem:[%s3565_s5 + $0x27] sm:$0x1 pattern:$0x73625140] %v1929_v10 }
 0x86e   :  { %v1959_v38 = vrot.slane %v1931_v1, %v2913_v4  ;;  %v1961_v39 = vcombine.high %v1945_v32, %v1945_v32  ;;  %v1962_v40 = vcombine.high %v1952_v33, %v1952_v33  ;;  %1974 = vst [vmem:[%s3565_s5 + $0x17] sm:$0x1] %v1960_v36  ;;  %2084 = vst.sshfl [vmem:[%s3565_s5 + $0x2f] sm:$0x1 pattern:$0x73625140] %v1931_v1 }
 0x870   :  { %v1963_v41 = vcombine.high %v1959_v38, %v1959_v38  ;;  %1975 = vst [vmem:[%s3565_s5 + $0x1f] sm:$0x1] %v1962_v40  ;;  %1978 = vst [vmem:[%s3565_s5 + $0x37] sm:$0x1] %v1961_v39 }
 0x872   :  { %1979 = vst [vmem:[%s3565_s5 + $0x3f] sm:$0x1] %v1963_v41 }

</bundles_post_ra>
